<compile_context>
chip_gen: v7x
topology: tpu7x:2x2x1
jax: 0.10.0
libtpu: 0.0.40
codegen_flags: <defaults>
</compile_context>

<pallas_src>
import numpy as np
import jax
import jax.numpy as jnp
from jax.experimental import pallas as pl
from jax.experimental.pallas import tpu as pltpu


# ----------------------------------------------------------------------------
# Bilinear (align_corners=True) interpolation matrices -- matches
# F.interpolate(x, (H, W), mode="bilinear", align_corners=True)
# ----------------------------------------------------------------------------
def _interp_matrix_1d(out_size: int, in_size: int) -> np.ndarray:
    m = np.zeros((out_size, in_size), dtype=np.float32)
    if in_size == 1 or out_size == 1:
        m[:, 0] = 1.0
        return m
    src = np.arange(out_size, dtype=np.float64) * (in_size - 1) / (out_size - 1)
    i0 = np.clip(np.floor(src).astype(np.int64), 0, in_size - 2)
    frac = (src - i0).astype(np.float32)
    rows = np.arange(out_size)
    m[rows, i0] += 1.0 - frac
    m[rows, i0 + 1] += frac
    return m


def _upsample_matrix(h_out, w_out, h_in, w_in) -> np.ndarray:
    rh = _interp_matrix_1d(h_out, h_in)
    rw = _interp_matrix_1d(w_out, w_in)
    return np.kron(rh, rw)  # (h_out*w_out, h_in*w_in)


def _upsample_matrix_T(h_out, w_out, h_in, w_in) -> jnp.ndarray:
    # Transposed form (HW_lo, HW_hi) for the (C, HW) layout: up = lo @ rT.
    return jnp.asarray(np.ascontiguousarray(
        _upsample_matrix(h_out, w_out, h_in, w_in).T))


# ----------------------------------------------------------------------------
# Fused Pallas kernel: localUp4 followed by localUp3, intermediate in VMEM
# ----------------------------------------------------------------------------
def _fpn_head_kernel(c3_ref, c4_ref, c2_ref,
                     w4_ref, s4_ref, b4_ref,
                     w3_ref, s3_ref, b3_ref,
                     r4_ref, r3_ref, out_ref):
    # c3_ref: (1, 1024, HW3)  high-res input of localUp4   (C, HW layout)
    # c4_ref: (1, Cout, HW4)  low-res input of localUp4
    # c2_ref: (1, 512,  HW2)  high-res input of localUp3
    # w*_ref: (Cout, Cin)     1x1 conv weights (PyTorch (Cout,Cin,1,1) squeezed)
    # s*/b*:  (Cout, 1)       folded BatchNorm scale/bias (lane-broadcast)
    # r4_ref: (HW4, HW3)      transposed bilinear matrix  (4x4 -> 8x8)
    # r3_ref: (HW3, HW2)      transposed bilinear matrix  (8x8 -> 16x16)
    # out_ref:(1, Cout, HW2)

    # ---- Stage 1: localUp4(c3, c4) = relu(bn(conv(c3))) + up(c4) ----
    y4 = jnp.dot(w4_ref[...], c3_ref[0],
                 preferred_element_type=jnp.float32)          # (Cout, HW3)
    y4 = jnp.maximum(y4 * s4_ref[...] + b4_ref[...], 0.0)     # BN + ReLU
    up4 = jnp.dot(c4_ref[0], r4_ref[...],
                  preferred_element_type=jnp.float32)         # (Cout, HW3)
    mid = y4 + up4                                            # stays in VMEM/vregs

    # ---- Stage 2: localUp3(c2, mid) = relu(bn(conv(c2))) + up(mid) ----
    y3 = jnp.dot(w3_ref[...], c2_ref[0],
                 preferred_element_type=jnp.float32)          # (Cout, HW2)
    y3 = jnp.maximum(y3 * s3_ref[...] + b3_ref[...], 0.0)     # BN + ReLU
    up3 = jnp.dot(mid, r3_ref[...],
                  preferred_element_type=jnp.float32)         # (Cout, HW2)
    out_ref[0] = (y3 + up3).astype(out_ref.dtype)


def fcn_fpn_head(c1, c2, c3, c4, params):
    """fcn_fpnHead.forward(c1, c2, c3, c4)  (c1 is unused, as in PyTorch)."""
    del c1
    n, cin3, H3, W3 = c3.shape          # 1024-channel branch, low-mid res
    _, cout, H4, W4 = c4.shape          # head-width branch, lowest res
    _, cin2, H2, W2 = c2.shape          # 512-channel branch, highest res
    hw2, hw3, hw4 = H2 * W2, H3 * W3, H4 * W4

    # NCHW -> (N, C, H*W): pure reshape, no transpose / data movement.
    x3 = c3.reshape(n, cin3, hw3)
    x4 = c4.reshape(n, cout, hw4)
    x2 = c2.reshape(n, cin2, hw2)

    r4t = _upsample_matrix_T(H3, W3, H4, W4)   # (hw4, hw3)
    r3t = _upsample_matrix_T(H2, W2, H3, W3)   # (hw3, hw2)

    out = pl.pallas_call(
        _fpn_head_kernel,
        out_shape=jax.ShapeDtypeStruct((n, cout, hw2), jnp.float32),
        grid=(n,),
        in_specs=[
            pl.BlockSpec((1, cin3, hw3), lambda i: (i, 0, 0)),   # c3
            pl.BlockSpec((1, cout, hw4), lambda i: (i, 0, 0)),   # c4
            pl.BlockSpec((1, cin2, hw2), lambda i: (i, 0, 0)),   # c2
            pl.BlockSpec((cout, cin3), lambda i: (0, 0)),        # w4
            pl.BlockSpec((cout, 1), lambda i: (0, 0)),           # scale4
            pl.BlockSpec((cout, 1), lambda i: (0, 0)),           # bias4
            pl.BlockSpec((cout, cin2), lambda i: (0, 0)),        # w3
            pl.BlockSpec((cout, 1), lambda i: (0, 0)),           # scale3
            pl.BlockSpec((cout, 1), lambda i: (0, 0)),           # bias3
            pl.BlockSpec((hw4, hw3), lambda i: (0, 0)),          # r4^T
            pl.BlockSpec((hw3, hw2), lambda i: (0, 0)),          # r3^T
        ],
        out_specs=pl.BlockSpec((1, cout, hw2), lambda i: (i, 0, 0)),
        compiler_params=pltpu.CompilerParams(
            dimension_semantics=("parallel",)),
    )(x3, x4, x2,
      params["w4"], params["scale4"], params["bias4"],
      params["w3"], params["scale3"], params["bias3"],
      r4t, r3t)

    return out.reshape(n, cout, H2, W2)   # already NCHW order


# ----------------------------------------------------------------------------
# Parameter construction (deterministic, synthetic) + pure-JAX reference
# ----------------------------------------------------------------------------
def make_params(key, in_channels):
    eps = 1e-5
    ks = jax.random.split(key, 10)

    def bn_fold(kg, kb, km, kv, c):
        gamma = jax.random.normal(kg, (c, 1), jnp.float32) * 0.1 + 1.0
        beta = jax.random.normal(kb, (c, 1), jnp.float32) * 0.1
        mean = jax.random.normal(km, (c, 1), jnp.float32) * 0.1
        var = jax.random.uniform(kv, (c, 1), jnp.float32, 0.5, 1.5)
        scale = gamma / jnp.sqrt(var + eps)
        bias = beta - mean * scale
        return scale, bias

    # Conv weights stored as (Cout, Cin) == PyTorch (Cout, Cin, 1, 1) squeezed.
    w4 = jax.random.normal(ks[0], (in_channels, 1024), jnp.float32) * 0.02
    w3 = jax.random.normal(ks[1], (in_channels, 512), jnp.float32) * 0.02
    scale4, bias4 = bn_fold(ks[2], ks[3], ks[4], ks[5], in_channels)
    scale3, bias3 = bn_fold(ks[6], ks[7], ks[8], ks[9], in_channels)
    return {"w4": w4, "scale4": scale4, "bias4": bias4,
            "w3": w3, "scale3": scale3, "bias3": bias3}


def _ref_local_up(x_hi, x_lo, w, scale, bias):
    n, cin, H, W = x_hi.shape
    _, cout, h, wl = x_lo.shape
    xh = x_hi.reshape(n, cin, H * W)
    y = jnp.maximum(jnp.einsum("oc,ncs->nos", w, xh) * scale + bias, 0.0)
    lo = x_lo.reshape(n, cout, h * wl)
    R = jnp.asarray(_upsample_matrix(H, W, h, wl))   # (HW_hi, HW_lo)
    up = jnp.einsum("nos,Ss->noS", lo, R)
    return (y + up).reshape(n, cout, H, W)


def _ref_head(c1, c2, c3, c4, p):
    del c1
    out = _ref_local_up(c3, c4, p["w4"], p["scale4"], p["bias4"])
    return _ref_local_up(c2, out, p["w3"], p["scale3"], p["bias3"])


if __name__ == "__main__":
    key = jax.random.PRNGKey(0)
    k1, k2, k3, k4, kp = jax.random.split(key, 5)

    in_channels = 32   # head channel width (== channels of c4)
    batch = 2
    # NCHW inputs, channel counts per the module (512 for c2, 1024 for c3).
    c1 = jax.random.normal(k1, (batch, 64, 32, 32), jnp.float32)    # unused by forward
    c2 = jax.random.normal(k2, (batch, 512, 16, 16), jnp.float32)
    c3 = jax.random.normal(k3, (batch, 1024, 8, 8), jnp.float32)
    c4 = jax.random.normal(k4, (batch, in_channels, 4, 4), jnp.float32)

    params = make_params(kp, in_channels)

    out = fcn_fpn_head(c1, c2, c3, c4, params)
    out = jax.block_until_ready(out)

    ref = jax.block_until_ready(_ref_head(c1, c2, c3, c4, params))
    assert out.shape == (batch, in_channels, 16, 16), out.shape
    np.testing.assert_allclose(np.asarray(out), np.asarray(ref), rtol=1e-4, atol=1e-4)

    print("KERNEL_OK")
</pallas_src>

<mosaic_0001>
module attributes {stable_mosaic.version = 11 : i64} {
  func.func @_fpn_head_kernel(%arg0: i32, %arg1: memref<1x1024x64xf32, #tpu.memory_space<vmem>>, %arg2: memref<1x32x16xf32, #tpu.memory_space<vmem>>, %arg3: memref<1x512x256xf32, #tpu.memory_space<vmem>>, %arg4: memref<32x1024xf32, #tpu.memory_space<vmem>>, %arg5: memref<32x1xf32, #tpu.memory_space<vmem>>, %arg6: memref<32x1xf32, #tpu.memory_space<vmem>>, %arg7: memref<32x512xf32, #tpu.memory_space<vmem>>, %arg8: memref<32x1xf32, #tpu.memory_space<vmem>>, %arg9: memref<32x1xf32, #tpu.memory_space<vmem>>, %arg10: memref<16x64xf32, #tpu.memory_space<vmem>>, %arg11: memref<64x256xf32, #tpu.memory_space<vmem>>, %arg12: memref<1x32x256xf32, #tpu.memory_space<vmem>>) attributes {dimension_semantics = [#tpu.dimension_semantics<parallel>], iteration_bounds = array<i64: 2>, scalar_prefetch = 0 : i64, scratch_operands = 0 : i64, tpu.core_type = #tpu.core_type<tc>, window_params = [{transform_indices = @transform_0, window_bounds = array<i64: 1, 1024, 64>}, {transform_indices = @transform_1, window_bounds = array<i64: 1, 32, 16>}, {transform_indices = @transform_2, window_bounds = array<i64: 1, 512, 256>}, {pipeline_mode = #tpu.pipeline_mode<synchronous>, transform_indices = @transform_3, window_bounds = array<i64: 32, 1024>}, {pipeline_mode = #tpu.pipeline_mode<synchronous>, transform_indices = @transform_4, window_bounds = array<i64: 32, 1>}, {pipeline_mode = #tpu.pipeline_mode<synchronous>, transform_indices = @transform_5, window_bounds = array<i64: 32, 1>}, {pipeline_mode = #tpu.pipeline_mode<synchronous>, transform_indices = @transform_6, window_bounds = array<i64: 32, 512>}, {pipeline_mode = #tpu.pipeline_mode<synchronous>, transform_indices = @transform_7, window_bounds = array<i64: 32, 1>}, {pipeline_mode = #tpu.pipeline_mode<synchronous>, transform_indices = @transform_8, window_bounds = array<i64: 32, 1>}, {pipeline_mode = #tpu.pipeline_mode<synchronous>, transform_indices = @transform_9, window_bounds = array<i64: 16, 64>}, {pipeline_mode = #tpu.pipeline_mode<synchronous>, transform_indices = @transform_10, window_bounds = array<i64: 64, 256>}, {transform_indices = @transform_11, window_bounds = array<i64: 1, 32, 256>}]} {
    %c0 = arith.constant 0 : index
    %c0_0 = arith.constant 0 : index
    %0 = vector.load %arg4[%c0, %c0_0] : memref<32x1024xf32, #tpu.memory_space<vmem>>, vector<32x1024xf32>
    %c0_1 = arith.constant 0 : index
    %c0_2 = arith.constant 0 : index
    %c0_3 = arith.constant 0 : index
    %1 = vector.load %arg1[%c0_1, %c0_2, %c0_3] : memref<1x1024x64xf32, #tpu.memory_space<vmem>>, vector<1x1024x64xf32>
    %2 = vector.shape_cast %1 : vector<1x1024x64xf32> to vector<1024x64xf32>
    %cst = arith.constant dense<0.000000e+00> : vector<32x64xf32>
    %3 = tpu.matmul %0, %2, %cst {dimension_numbers = #tpu.dot_dimension_numbers<[1], [0], [0], [1], [0, 0, 1, 1], [], []>} : vector<32x1024xf32>, vector<1024x64xf32>, vector<32x64xf32> -> vector<32x64xf32>
    %c0_4 = arith.constant 0 : index
    %c0_5 = arith.constant 0 : index
    %4 = vector.load %arg5[%c0_4, %c0_5] : memref<32x1xf32, #tpu.memory_space<vmem>>, vector<32x1xf32>
    %5 = vector.broadcast %4 : vector<32x1xf32> to vector<32x64xf32>
    %6 = arith.mulf %3, %5 : vector<32x64xf32>
    %c0_6 = arith.constant 0 : index
    %c0_7 = arith.constant 0 : index
    %7 = vector.load %arg6[%c0_6, %c0_7] : memref<32x1xf32, #tpu.memory_space<vmem>>, vector<32x1xf32>
    %8 = vector.broadcast %7 : vector<32x1xf32> to vector<32x64xf32>
    %9 = arith.addf %6, %8 : vector<32x64xf32>
    %cst_8 = arith.constant 0.000000e+00 : f32
    %10 = vector.broadcast %cst_8 : f32 to vector<32x64xf32>
    %11 = arith.maximumf %9, %10 : vector<32x64xf32>
    %c0_9 = arith.constant 0 : index
    %c0_10 = arith.constant 0 : index
    %c0_11 = arith.constant 0 : index
    %12 = vector.load %arg2[%c0_9, %c0_10, %c0_11] : memref<1x32x16xf32, #tpu.memory_space<vmem>>, vector<1x32x16xf32>
    %13 = vector.shape_cast %12 : vector<1x32x16xf32> to vector<32x16xf32>
    %c0_12 = arith.constant 0 : index
    %c0_13 = arith.constant 0 : index
    %14 = vector.load %arg10[%c0_12, %c0_13] : memref<16x64xf32, #tpu.memory_space<vmem>>, vector<16x64xf32>
    %cst_14 = arith.constant dense<0.000000e+00> : vector<32x64xf32>
    %15 = tpu.matmul %13, %14, %cst_14 {dimension_numbers = #tpu.dot_dimension_numbers<[1], [0], [0], [1], [0, 0, 1, 1], [], []>} : vector<32x16xf32>, vector<16x64xf32>, vector<32x64xf32> -> vector<32x64xf32>
    %16 = arith.addf %11, %15 : vector<32x64xf32>
    %c0_15 = arith.constant 0 : index
    %c0_16 = arith.constant 0 : index
    %17 = vector.load %arg7[%c0_15, %c0_16] : memref<32x512xf32, #tpu.memory_space<vmem>>, vector<32x512xf32>
    %c0_17 = arith.constant 0 : index
    %c0_18 = arith.constant 0 : index
    %c0_19 = arith.constant 0 : index
    %18 = vector.load %arg3[%c0_17, %c0_18, %c0_19] : memref<1x512x256xf32, #tpu.memory_space<vmem>>, vector<1x512x256xf32>
    %19 = vector.shape_cast %18 : vector<1x512x256xf32> to vector<512x256xf32>
    %cst_20 = arith.constant dense<0.000000e+00> : vector<32x256xf32>
    %20 = tpu.matmul %17, %19, %cst_20 {dimension_numbers = #tpu.dot_dimension_numbers<[1], [0], [0], [1], [0, 0, 1, 1], [], []>} : vector<32x512xf32>, vector<512x256xf32>, vector<32x256xf32> -> vector<32x256xf32>
    %c0_21 = arith.constant 0 : index
    %c0_22 = arith.constant 0 : index
    %21 = vector.load %arg8[%c0_21, %c0_22] : memref<32x1xf32, #tpu.memory_space<vmem>>, vector<32x1xf32>
    %22 = vector.broadcast %21 : vector<32x1xf32> to vector<32x256xf32>
    %23 = arith.mulf %20, %22 : vector<32x256xf32>
    %c0_23 = arith.constant 0 : index
    %c0_24 = arith.constant 0 : index
    %24 = vector.load %arg9[%c0_23, %c0_24] : memref<32x1xf32, #tpu.memory_space<vmem>>, vector<32x1xf32>
    %25 = vector.broadcast %24 : vector<32x1xf32> to vector<32x256xf32>
    %26 = arith.addf %23, %25 : vector<32x256xf32>
    %cst_25 = arith.constant 0.000000e+00 : f32
    %27 = vector.broadcast %cst_25 : f32 to vector<32x256xf32>
    %28 = arith.maximumf %26, %27 : vector<32x256xf32>
    %c0_26 = arith.constant 0 : index
    %c0_27 = arith.constant 0 : index
    %29 = vector.load %arg11[%c0_26, %c0_27] : memref<64x256xf32, #tpu.memory_space<vmem>>, vector<64x256xf32>
    %cst_28 = arith.constant dense<0.000000e+00> : vector<32x256xf32>
    %30 = tpu.matmul %16, %29, %cst_28 {dimension_numbers = #tpu.dot_dimension_numbers<[1], [0], [0], [1], [0, 0, 1, 1], [], []>} : vector<32x64xf32>, vector<64x256xf32>, vector<32x256xf32> -> vector<32x256xf32>
    %31 = arith.addf %28, %30 : vector<32x256xf32>
    %c0_29 = arith.constant 0 : index
    %c0_30 = arith.constant 0 : index
    %c0_31 = arith.constant 0 : index
    %32 = vector.load %arg12[%c0_29, %c0_30, %c0_31] : memref<1x32x256xf32, #tpu.memory_space<vmem>>, vector<1x32x256xf32>
    %33 = vector.shape_cast %32 : vector<1x32x256xf32> to vector<32x256xf32>
    %34 = vector.shape_cast %31 : vector<32x256xf32> to vector<1x32x256xf32>
    tpu.vector_store %arg12[%c0_29, %c0_30, %c0_31], %34 {strides = array<i32>} : memref<1x32x256xf32, #tpu.memory_space<vmem>>, vector<1x32x256xf32>,
    return
  }
  func.func @transform_0(%arg0: i32) -> (i32, i32, i32) {
    %c0_i32 = arith.constant 0 : i32
    %c0_i32_0 = arith.constant 0 : i32
    %c0_i32_1 = arith.constant 0 : i32
    return %arg0, %c0_i32, %c0_i32_0 : i32, i32, i32
  }
  func.func @transform_1(%arg0: i32) -> (i32, i32, i32) {
    %c0_i32 = arith.constant 0 : i32
    %c0_i32_0 = arith.constant 0 : i32
    %c0_i32_1 = arith.constant 0 : i32
    return %arg0, %c0_i32, %c0_i32_0 : i32, i32, i32
  }
  func.func @transform_2(%arg0: i32) -> (i32, i32, i32) {
    %c0_i32 = arith.constant 0 : i32
    %c0_i32_0 = arith.constant 0 : i32
    %c0_i32_1 = arith.constant 0 : i32
    return %arg0, %c0_i32, %c0_i32_0 : i32, i32, i32
  }
  func.func @transform_3(%arg0: i32) -> (i32, i32) {
    %c0_i32 = arith.constant 0 : i32
    %c0_i32_0 = arith.constant 0 : i32
    %c0_i32_1 = arith.constant 0 : i32
    return %c0_i32, %c0_i32_0 : i32, i32
  }
  func.func @transform_4(%arg0: i32) -> (i32, i32) {
    %c0_i32 = arith.constant 0 : i32
    %c0_i32_0 = arith.constant 0 : i32
    %c0_i32_1 = arith.constant 0 : i32
    return %c0_i32, %c0_i32_0 : i32, i32
  }
  func.func @transform_5(%arg0: i32) -> (i32, i32) {
    %c0_i32 = arith.constant 0 : i32
    %c0_i32_0 = arith.constant 0 : i32
    %c0_i32_1 = arith.constant 0 : i32
    return %c0_i32, %c0_i32_0 : i32, i32
  }
  func.func @transform_6(%arg0: i32) -> (i32, i32) {
    %c0_i32 = arith.constant 0 : i32
    %c0_i32_0 = arith.constant 0 : i32
    %c0_i32_1 = arith.constant 0 : i32
    return %c0_i32, %c0_i32_0 : i32, i32
  }
  func.func @transform_7(%arg0: i32) -> (i32, i32) {
    %c0_i32 = arith.constant 0 : i32
    %c0_i32_0 = arith.constant 0 : i32
    %c0_i32_1 = arith.constant 0 : i32
    return %c0_i32, %c0_i32_0 : i32, i32
  }
  func.func @transform_8(%arg0: i32) -> (i32, i32) {
    %c0_i32 = arith.constant 0 : i32
    %c0_i32_0 = arith.constant 0 : i32
    %c0_i32_1 = arith.constant 0 : i32
    return %c0_i32, %c0_i32_0 : i32, i32
  }
  func.func @transform_9(%arg0: i32) -> (i32, i32) {
    %c0_i32 = arith.constant 0 : i32
    %c0_i32_0 = arith.constant 0 : i32
    %c0_i32_1 = arith.constant 0 : i32
    return %c0_i32, %c0_i32_0 : i32, i32
  }
  func.func @transform_10(%arg0: i32) -> (i32, i32) {
    %c0_i32 = arith.constant 0 : i32
    %c0_i32_0 = arith.constant 0 : i32
    %c0_i32_1 = arith.constant 0 : i32
    return %c0_i32, %c0_i32_0 : i32, i32
  }
  func.func @transform_11(%arg0: i32) -> (i32, i32, i32) {
    %c0_i32 = arith.constant 0 : i32
    %c0_i32_0 = arith.constant 0 : i32
    %c0_i32_1 = arith.constant 0 : i32
    return %arg0, %c0_i32, %c0_i32_0 : i32, i32, i32
  }
}

</mosaic_0001>

<bundles_post_ra>
// kernel: tpu_custom_call.1
= control target key start
LH: loop header
LB: loop body
LE: loop exit
PB: predicated region body
PF: predicated region fallthrough
CT: control target
= control target key end

     0   :  { %s3055_s0 = inlined_call_operand.vmem [shape: f32[2,1024,64], index: 0, kind: input, shape index: {}]   ;;  %s3056_s1 = inlined_call_operand.vmem [shape: f32[2,32,16], index: 1, kind: input, shape index: {}]   ;;  %s3057_s2 = inlined_call_operand.vmem [shape: f32[2,512,256], index: 2, kind: input, shape index: {}]   ;;  %s3058_s3 = inlined_call_operand.vmem [shape: f32[32,1024], index: 3, kind: input, shape index: {}]   ;;  %s3059_s4 = inlined_call_operand.vmem [shape: f32[32,1], index: 4, kind: input, shape index: {}]   ;;  %s3060_s5 = inlined_call_operand.vmem [shape: f32[32,1], index: 5, kind: input, shape index: {}]   ;;  %s3061_s6 = inlined_call_operand.vmem [shape: f32[32,512], index: 6, kind: input, shape index: {}]   ;;  %s3062_s7 = inlined_call_operand.vmem [shape: f32[32,1], index: 7, kind: input, shape index: {}]   ;;  %s3063_s8 = inlined_call_operand.vmem [shape: f32[32,1], index: 8, kind: input, shape index: {}]   ;;  %s3064_s9 = inlined_call_operand.vmem [shape: f32[16,64], index: 9, kind: input, shape index: {}]   ;;  %s3065_s10 = inlined_call_operand.vmem [shape: f32[64,256], index: 10, kind: input, shape index: {}]   ;;  %s3066_s11 = inlined_call_operand.hbm [shape: f32[2,32,256], index: 11, kind: output, shape index: {}]  }
   0x1   :  { %3067 = sst [smem:[#allocation5_spill]] %s3055_s0 }
   0x2   :  { %16 = vsyncpa [#allocation3], 0 }
   0x3   :  { %18 = vsyncpa [#allocation3 + $0x1], 0  ;;  %s2399_s17 = smov 0   ;;  %s2401_s18 = smov 0  }
   0x4   :  { %s2403_s19 = smov 0   ;;  %s2405_s20 = smov 0  }
   0x5 LB: > { %s2420_s21 = sadd.s32 4294967295, %s2332_s20   ;;  %s1721_s22 = sadd.s32 4294967294, %s2332_s20   ;;  %s2332_s20 = sphi %s2405_s20, %s3074_s20   ;;  %s2328_s19 = sphi %s2403_s19, %s3073_s19   ;;  %s2324_s18 = sphi %s2401_s18, %s3072_s18   ;;  %s2320_s17 = sphi %s2399_s17, %s3071_s17  }
   0x6   : > { %s2424_s23 = sadd.s32 1, %s2332_s20   ;;  %s277_s24 = sadd.s32 1, %s2328_s19 }
   0x7   : > { %s274_s25 = ssub.s32 %s2332_s20, %s2424_s23  ;;  %p287_p0 = scmp.ne.s32.totalorder %s2328_s19, %s2324_s18 }
   0x8   : > { %p275_p1 = scmp.eq.s32.totalorder %s274_s25, 0  ;;  %p288_p2 = scmp.eq.s32.totalorder %s2420_s21, 1 }
   0x9   : > { %p293_p3 = scmp.ne.s32.totalorder %s2324_s18, %s2320_s17  ;;  %p294_p4 = scmp.eq.s32.totalorder %s1721_s22, 1 }
   0xa   : > { %s2435_s26 = scalar_select %p275_p1, %s2328_s19, %s277_s24  }
   0xb   : > { %p2437_p5 = por %p288_p2, %p287_p0  ;;  %p2441_p6 = por %p294_p4, %p293_p3 }
   0xc   : > { %p1724_p7 = scmp.ge.s32.totalorder %s2332_s20, 1  ;;  %p360_p8 = scmp.lt.s32.totalorder %s2332_s20, 3 }
   0xe   : > { %p361_p9 = pnand %p1724_p7, %p360_p8 }
   0xf   : > { %p410_p10 = scmp.lt.s32.totalorder (!%p361_p9), %s2420_s21, 1  ;;  %v426_v0 = vld [vmem:[%s3058_s3 + $0x8] sm:$0xff] (!%p361_p9)  ;;  %v432_v1 = vld [vmem:[%s3058_s3 + $0x38] sm:$0xff] (!%p361_p9)  ;;  %s3070_s0 = sld [smem:[#allocation5_spill]] (!%p361_p9)  ;;  %vm991_vm0 = vcmask (!%p361_p9), 130048   ;;  %vm1503_vm1 = vcmask (!%p361_p9), 523264  }
  0x10   : > { %364 = sbr.rel (%p361_p9) target bundleno = 600 (0x258), region = 64  ;;  %649 = vmatprep.mubr.f32.mxu0 (!%p361_p9), %v426_v0  ;;  %904 = vmatprep.mubr.f32.mxu1 (!%p361_p9), %v432_v1  ;;  %s407_s12 = sand.u32 (!%p361_p9), 1, %s2324_s18  }
  0x17   : > { %s2455_s14 = scalar_select %p410_p10, %s2420_s21, 1 }
  0x19   : > { %s1745_s15 = sshll.u32 %s2455_s14, 10  ;;  %s1746_s13 = sshll.u32 %s2455_s14, 5 }
  0x1a   : > { %s2463_s24 = scalar_lea.vmem %s3070_s0, %s1745_s15  ;;  %s2530_s30 = scalar_lea.vmem %s3057_s2, %s1745_s15 }
  0x1b   : > { %v473_v2 = vld [vmem:[%s2463_s24 + $0x80] sm:$0xff]  ;;  %v474_v3 = vld [vmem:[%s2463_s24 + $0x88] sm:$0xff]  ;;  %v475_v13 = vld [vmem:[%s2463_s24 + $0x90] sm:$0xff]  ;;  %s2810_s25 = scalar_lea.vmem %s3056_s1, %s1746_s13  ;;  %s1725_s15 = sshll.u32 %s407_s12, 6 }
  0x1c   : > { %v569_v4 = vld [vmem:[%s2463_s24 + $0x380] sm:$0xff]  ;;  %v1941_v5 = vpack.c.bf16 %v474_v3, %v473_v2  ;;  %v570_v6 = vld [vmem:[%s2463_s24 + $0x388] sm:$0xff]  ;;  %v476_v15 = vld [vmem:[%s2463_s24 + $0x98] sm:$0xff]  ;;  %s2993_s13 = scalar_lea.vmem [#allocation2], %s1725_s15  ;;  %s1748_s0 = sshll.u32 %s2420_s21, 10 }
  0x1d   : > { %v457_v7 = vld [vmem:[%s2463_s24] sm:$0xff]  ;;  %v458_v8 = vld [vmem:[%s2463_s24 + $0x8] sm:$0xff]  ;;  %v2037_v9 = vpack.c.bf16 %v570_v6, %v569_v4  ;;  %v571_v16 = vld [vmem:[%s2463_s24 + $0x390] sm:$0xff]  ;;  %v1945_v18 = vpack.c.bf16 %v476_v15, %v475_v13  ;;  %s3006_s22 = scalar_lea.hbm %s3066_s11, %s1748_s0  ;;  %s3014_s21 = scalar_lea.sflag [#allocation3], %s407_s12 }
  0x1e   : > { %v1943_v10 = vpack.c.bf16 %v458_v8, %v457_v7  ;;  %v553_v11 = vld [vmem:[%s2463_s24 + $0x300] sm:$0xff]  ;;  %v554_v12 = vld [vmem:[%s2463_s24 + $0x308] sm:$0xff]  ;;  %1942 = vmatprep.subr.bf16.mxu0 %v1941_v5  ;;  %v572_v17 = vld [vmem:[%s2463_s24 + $0x398] sm:$0xff] }
  0x1f   : > { %v2039_v14 = vpack.c.bf16 %v554_v12, %v553_v11  ;;  %2038 = vmatprep.subr.bf16.mxu1 %v2037_v9  ;;  %v2041_v19 = vpack.c.bf16 %v572_v17, %v571_v16  ;;  %v459_v20 = vld [vmem:[%s2463_s24 + $0x10] sm:$0xff]  ;;  %v460_v21 = vld [vmem:[%s2463_s24 + $0x18] sm:$0xff]  ;;  %v477_v25 = vld [vmem:[%s2463_s24 + $0xa0] sm:$0xff] }
  0x20   : > { %1944 = vmatpush3.bf16.msra.mxu0 %v1943_v10  ;;  %v555_v22 = vld [vmem:[%s2463_s24 + $0x310] sm:$0xff]  ;;  %v1947_v23 = vpack.c.bf16 %v460_v21, %v459_v20  ;;  %v556_v24 = vld [vmem:[%s2463_s24 + $0x318] sm:$0xff]  ;;  %v478_v26 = vld [vmem:[%s2463_s24 + $0xa8] sm:$0xff] }
  0x21   : > { %2040 = vmatpush3.bf16.msra.mxu1 %v2039_v14  ;;  %1946 = vmatprep.subr.bf16.mxu0 %v1945_v18  ;;  %v2043_v27 = vpack.c.bf16 %v556_v24, %v555_v22  ;;  %v1949_v28 = vpack.c.bf16 %v478_v26, %v477_v25  ;;  %v573_v29 = vld [vmem:[%s2463_s24 + $0x3a0] sm:$0xff]  ;;  %v574_v30 = vld [vmem:[%s2463_s24 + $0x3a8] sm:$0xff]  ;;  %v479_v37 = vld [vmem:[%s2463_s24 + $0xb0] sm:$0xff] }
  0x22   : > { %2042 = vmatprep.subr.bf16.mxu1 %v2041_v19  ;;  %v461_v31 = vld [vmem:[%s2463_s24 + $0x20] sm:$0xff]  ;;  %v2045_v32 = vpack.c.bf16 %v574_v30, %v573_v29  ;;  %v462_v33 = vld [vmem:[%s2463_s24 + $0x28] sm:$0xff]  ;;  %v480_v38 = vld [vmem:[%s2463_s24 + $0xb8] sm:$0xff] }
  0x23   : > { %v557_v34 = vld [vmem:[%s2463_s24 + $0x320] sm:$0xff]  ;;  %v558_v35 = vld [vmem:[%s2463_s24 + $0x328] sm:$0xff]  ;;  %v1951_v36 = vpack.c.bf16 %v462_v33, %v461_v31  ;;  %v575_v39 = vld [vmem:[%s2463_s24 + $0x3b0] sm:$0xff]  ;;  %v1953_v41 = vpack.c.bf16 %v480_v38, %v479_v37 }
  0x24   : > { %1948 = vmatpush3.bf16.msra.mxu0 %v1947_v23  ;;  %v2047_v40 = vpack.c.bf16 %v558_v35, %v557_v34  ;;  %v576_v42 = vld [vmem:[%s2463_s24 + $0x3b8] sm:$0xff]  ;;  %v463_v43 = vld [vmem:[%s2463_s24 + $0x30] sm:$0xff]  ;;  %v481_v48 = vld [vmem:[%s2463_s24 + $0xc0] sm:$0xff] }
  0x25   : > { %2044 = vmatpush3.bf16.msra.mxu1 %v2043_v27  ;;  %1950 = vmatprep.subr.bf16.mxu0 %v1949_v28  ;;  %v464_v44 = vld [vmem:[%s2463_s24 + $0x38] sm:$0xff]  ;;  %v2049_v45 = vpack.c.bf16 %v576_v42, %v575_v39  ;;  %v559_v46 = vld [vmem:[%s2463_s24 + $0x330] sm:$0xff]  ;;  %v482_v49 = vld [vmem:[%s2463_s24 + $0xc8] sm:$0xff] }
  0x26   : > { %2046 = vmatprep.subr.bf16.mxu1 %v2045_v32  ;;  %v560_v47 = vld [vmem:[%s2463_s24 + $0x338] sm:$0xff]  ;;  %v577_v50 = vld [vmem:[%s2463_s24 + $0x3c0] sm:$0xff]  ;;  %v578_v51 = vld [vmem:[%s2463_s24 + $0x3c8] sm:$0xff]  ;;  %v1955_v52 = vpack.c.bf16 %v464_v44, %v463_v43  ;;  %v1957_v54 = vpack.c.bf16 %v482_v49, %v481_v48 }
  0x27   : > { %v2051_v53 = vpack.c.bf16 %v560_v47, %v559_v46  ;;  %v465_v55 = vld [vmem:[%s2463_s24 + $0x40] sm:$0xff]  ;;  %v466_v56 = vld [vmem:[%s2463_s24 + $0x48] sm:$0xff]  ;;  %v2053_v58 = vpack.c.bf16 %v578_v51, %v577_v50  ;;  %v483_v60 = vld [vmem:[%s2463_s24 + $0xd0] sm:$0xff] }
  0x28   : > { %1952 = vmatpush3.bf16.msra.mxu0 %v1951_v36  ;;  %v561_v57 = vld [vmem:[%s2463_s24 + $0x340] sm:$0xff]  ;;  %v562_v59 = vld [vmem:[%s2463_s24 + $0x348] sm:$0xff]  ;;  %v484_v61 = vld [vmem:[%s2463_s24 + $0xd8] sm:$0xff]  ;;  %v1959_v0 = vpack.c.bf16 %v466_v56, %v465_v55 }
  0x29   : > { %2048 = vmatpush3.bf16.msra.mxu1 %v2047_v40  ;;  %1954 = vmatprep.subr.bf16.mxu0 %v1953_v41  ;;  %v579_v62 = vld [vmem:[%s2463_s24 + $0x3d0] sm:$0xff]  ;;  %v580_v63 = vld [vmem:[%s2463_s24 + $0x3d8] sm:$0xff]  ;;  %v2055_v1 = vpack.c.bf16 %v562_v59, %v561_v57  ;;  %v1961_v2 = vpack.c.bf16 %v484_v61, %v483_v60  ;;  %v485_v8 = vld [vmem:[%s2463_s24 + $0xe0] sm:$0xff] }
  0x2a   : > { %2050 = vmatprep.subr.bf16.mxu1 %v2049_v45  ;;  %v467_v3 = vld [vmem:[%s2463_s24 + $0x50] sm:$0xff]  ;;  %v468_v4 = vld [vmem:[%s2463_s24 + $0x58] sm:$0xff]  ;;  %v2057_v6 = vpack.c.bf16 %v580_v63, %v579_v62  ;;  %v486_v9 = vld [vmem:[%s2463_s24 + $0xe8] sm:$0xff] }
  0x2b   : > { %v563_v5 = vld [vmem:[%s2463_s24 + $0x350] sm:$0xff]  ;;  %v564_v7 = vld [vmem:[%s2463_s24 + $0x358] sm:$0xff]  ;;  %v581_v10 = vld [vmem:[%s2463_s24 + $0x3e0] sm:$0xff]  ;;  %v1963_v12 = vpack.c.bf16 %v468_v4, %v467_v3  ;;  %v1965_v14 = vpack.c.bf16 %v486_v9, %v485_v8 }
  0x2c   : > { %1956 = vmatpush3.bf16.msra.mxu0 %v1955_v52  ;;  %v582_v11 = vld [vmem:[%s2463_s24 + $0x3e8] sm:$0xff]  ;;  %v2059_v13 = vpack.c.bf16 %v564_v7, %v563_v5  ;;  %v469_v15 = vld [vmem:[%s2463_s24 + $0x60] sm:$0xff]  ;;  %v487_v20 = vld [vmem:[%s2463_s24 + $0xf0] sm:$0xff] }
  0x2d   : > { %2052 = vmatpush3.bf16.msra.mxu1 %v2051_v53  ;;  %1958 = vmatprep.subr.bf16.mxu0 %v1957_v54  ;;  %v470_v16 = vld [vmem:[%s2463_s24 + $0x68] sm:$0xff]  ;;  %v565_v17 = vld [vmem:[%s2463_s24 + $0x360] sm:$0xff]  ;;  %v2061_v18 = vpack.c.bf16 %v582_v11, %v581_v10  ;;  %v488_v21 = vld [vmem:[%s2463_s24 + $0xf8] sm:$0xff] }
  0x2e   : > { %2054 = vmatprep.subr.bf16.mxu1 %v2053_v58  ;;  %v566_v19 = vld [vmem:[%s2463_s24 + $0x368] sm:$0xff]  ;;  %v583_v22 = vld [vmem:[%s2463_s24 + $0x3f0] sm:$0xff]  ;;  %v584_v23 = vld [vmem:[%s2463_s24 + $0x3f8] sm:$0xff]  ;;  %v1967_v24 = vpack.c.bf16 %v470_v16, %v469_v15  ;;  %v1969_v26 = vpack.c.bf16 %v488_v21, %v487_v20 }
  0x2f   : > { %v2063_v25 = vpack.c.bf16 %v566_v19, %v565_v17  ;;  %v471_v27 = vld [vmem:[%s2463_s24 + $0x70] sm:$0xff]  ;;  %v472_v28 = vld [vmem:[%s2463_s24 + $0x78] sm:$0xff]  ;;  %v2065_v30 = vpack.c.bf16 %v584_v23, %v583_v22  ;;  %v505_v32 = vld [vmem:[%s2463_s24 + $0x180] sm:$0xff] }
  0x30   : > { %1960 = vmatpush3.bf16.msra.mxu0 %v1959_v0  ;;  %v567_v29 = vld [vmem:[%s2463_s24 + $0x370] sm:$0xff]  ;;  %v568_v31 = vld [vmem:[%s2463_s24 + $0x378] sm:$0xff]  ;;  %v506_v33 = vld [vmem:[%s2463_s24 + $0x188] sm:$0xff]  ;;  %v1971_v36 = vpack.c.bf16 %v472_v28, %v471_v27 }
  0x31   : > { %2056 = vmatpush3.bf16.msra.mxu1 %v2055_v1  ;;  %1962 = vmatprep.subr.bf16.mxu0 %v1961_v2  ;;  %v1110_v34 = vld [vmem:[%s2530_s30 + $0x8] sm:$0xff]  ;;  %v1112_v35 = vld [vmem:[%s2530_s30 + $0x18] sm:$0xff]  ;;  %v2067_v37 = vpack.c.bf16 %v568_v31, %v567_v29  ;;  %v1973_v38 = vpack.c.bf16 %v506_v33, %v505_v32  ;;  %v489_v39 = vld [vmem:[%s2463_s24 + $0x100] sm:$0xff] }
  0x32   : > { %2058 = vmatprep.subr.bf16.mxu1 %v2057_v6  ;;  %v490_v40 = vld [vmem:[%s2463_s24 + $0x108] sm:$0xff]  ;;  %v1109_v41 = vld [vmem:[%s2530_s30] sm:$0xff]  ;;  %v2073_v42 = vpack.c.bf16 %v1112_v35, %v1110_v34  ;;  %v1111_v43 = vld [vmem:[%s2530_s30 + $0x10] sm:$0xff] }
  0x33   : > { %v507_v44 = vld [vmem:[%s2463_s24 + $0x190] sm:$0xff]  ;;  %v508_v45 = vld [vmem:[%s2463_s24 + $0x198] sm:$0xff]  ;;  %v1114_v46 = vld [vmem:[%s2530_s30 + $0x28] sm:$0xff]  ;;  %v1975_v49 = vpack.c.bf16 %v490_v40, %v489_v39  ;;  %v2075_v51 = vpack.c.bf16 %v1111_v43, %v1109_v41 }
  0x34   : > { %1964 = vmatpush3.bf16.msra.mxu0 %v1963_v12  ;;  %v1116_v47 = vld [vmem:[%s2530_s30 + $0x38] sm:$0xff]  ;;  %v425_v48 = vld [vmem:[%s3058_s3] sm:$0xff]  ;;  %v431_v50 = vld [vmem:[%s3058_s3 + $0x30] sm:$0xff]  ;;  %v1977_v52 = vpack.c.bf16 %v508_v45, %v507_v44 }
  0x35   : > { %2060 = vmatpush3.bf16.msra.mxu1 %v2059_v13  ;;  %1966 = vmatprep.subr.bf16.mxu0 %v1965_v14  ;;  %v491_v53 = vld [vmem:[%s2463_s24 + $0x110] sm:$0xff]  ;;  %v492_v54 = vld [vmem:[%s2463_s24 + $0x118] sm:$0xff]  ;;  %v1113_v55 = vld [vmem:[%s2530_s30 + $0x20] sm:$0xff]  ;;  %v2077_v56 = vpack.c.bf16 %v1116_v47, %v1114_v46  ;;  %v2334_v13 = vmov 0  }
  0x36   : > { %2062 = vmatprep.subr.bf16.mxu1 %v2061_v18  ;;  %v1115_v57 = vld [vmem:[%s2530_s30 + $0x30] sm:$0xff]  ;;  %v509_v58 = vld [vmem:[%s2463_s24 + $0x1a0] sm:$0xff]  ;;  %v510_v59 = vld [vmem:[%s2463_s24 + $0x1a8] sm:$0xff]  ;;  %v1979_v63 = vpack.c.bf16 %v492_v54, %v491_v53  ;;  %2268 = vset.pattern.permute.xlu0 %v2334_v13 }
  0x37   : > { %v1118_v60 = vld [vmem:[%s2530_s30 + $0x48] sm:$0xff]  ;;  %v1120_v61 = vld [vmem:[%s2530_s30 + $0x58] sm:$0xff]  ;;  %v433_v0 = vld [vmem:[%s3058_s3 + $0x40] sm:$0xff]  ;;  %v2079_v2 = vpack.c.bf16 %v1115_v57, %v1113_v55  ;;  %v1981_v3 = vpack.c.bf16 %v510_v59, %v509_v58  ;;  %2269 = vset.pattern.permute.xlu1 %v2334_v13 }
  0x38   : > { %1968 = vmatpush3.bf16.msra.mxu0 %v1967_v24  ;;  %v434_v62 = vld [vmem:[%s3058_s3 + $0x48] sm:$0xff]  ;;  %v493_v4 = vld [vmem:[%s2463_s24 + $0x120] sm:$0xff]  ;;  %v2081_v7 = vpack.c.bf16 %v1120_v61, %v1118_v60  ;;  %v1119_v8 = vld [vmem:[%s2530_s30 + $0x50] sm:$0xff] }
  0x39   : > { %2064 = vmatpush3.bf16.msra.mxu1 %v2063_v25  ;;  %1970 = vmatprep.subr.bf16.mxu0 %v1969_v26  ;;  %v442_v1 = vld [vmem:[%s3058_s3 + $0x88] sm:$0xff]  ;;  %v1117_v6 = vld [vmem:[%s2530_s30 + $0x40] sm:$0xff]  ;;  %v511_v9 = vld [vmem:[%s2463_s24 + $0x1b0] sm:$0xff] }
  0x3a   : > { %2066 = vmatprep.subr.bf16.mxu1 %v2065_v30  ;;  %v494_v5 = vld [vmem:[%s2463_s24 + $0x128] sm:$0xff]  ;;  %v512_v10 = vld [vmem:[%s2463_s24 + $0x1b8] sm:$0xff]  ;;  %v441_v15 = vld [vmem:[%s3058_s3 + $0x80] sm:$0xff]  ;;  %v2083_v17 = vpack.c.bf16 %v1119_v8, %v1117_v6 }
  0x3b   : > { %v1122_v11 = vld [vmem:[%s2530_s30 + $0x68] sm:$0xff]  ;;  %v1124_v12 = vld [vmem:[%s2530_s30 + $0x78] sm:$0xff]  ;;  %v1983_v14 = vpack.c.bf16 %v494_v5, %v493_v4  ;;  %v1985_v18 = vpack.c.bf16 %v512_v10, %v511_v9  ;;  %v495_v19 = vld [vmem:[%s2463_s24 + $0x130] sm:$0xff] }
  0x3c   : > { %1972 = vmatpush3.bf16.msra.mxu0 %v1971_v36  ;;  %v450_v16 = vld [vmem:[%s3058_s3 + $0xc8] sm:$0xff]  ;;  %v496_v20 = vld [vmem:[%s2463_s24 + $0x138] sm:$0xff]  ;;  %v1121_v21 = vld [vmem:[%s2530_s30 + $0x60] sm:$0xff]  ;;  %v2085_v22 = vpack.c.bf16 %v1124_v12, %v1122_v11 }
  0x3d   : > { %2068 = vmatpush3.bf16.msra.mxu1 %v2067_v37  ;;  %1974 = vmatprep.subr.bf16.mxu0 %v1973_v38  ;;  %v1123_v23 = vld [vmem:[%s2530_s30 + $0x70] sm:$0xff]  ;;  %v513_v24 = vld [vmem:[%s2463_s24 + $0x1c0] sm:$0xff]  ;;  %v514_v25 = vld [vmem:[%s2463_s24 + $0x1c8] sm:$0xff]  ;;  %v1987_v28 = vpack.c.bf16 %v496_v20, %v495_v19 }
  0x3e   : > { %2074 = vmatprep.subr.bf16.mxu1 %v2073_v42  ;;  %v1126_v26 = vld [vmem:[%s2530_s30 + $0x88] sm:$0xff]  ;;  %v1128_v27 = vld [vmem:[%s2530_s30 + $0x98] sm:$0xff]  ;;  %v449_v29 = vld [vmem:[%s3058_s3 + $0xc0] sm:$0xff]  ;;  %v2087_v31 = vpack.c.bf16 %v1123_v23, %v1121_v21  ;;  %v1989_v32 = vpack.c.bf16 %v514_v25, %v513_v24 }
  0x3f   : > { %650 = vmatmul.mubr.f32.vlgmr.msra.gmra.mrb[0].mxu0 %v425_v48  ;;  %v428_v30 = vld [vmem:[%s3058_s3 + $0x18] sm:$0xff]  ;;  %v497_v33 = vld [vmem:[%s2463_s24 + $0x140] sm:$0xff]  ;;  %v498_v34 = vld [vmem:[%s2463_s24 + $0x148] sm:$0xff]  ;;  %v2089_v36 = vpack.c.bf16 %v1128_v27, %v1126_v26 }
  0x40   : > { %1976 = vmatpush3.bf16.msra.mxu0 %v1975_v49  ;;  %905 = vmatmul.mubr.f32.vlgmr.msra.gmra.mrb[0].mxu1 %v431_v50  ;;  %v1125_v35 = vld [vmem:[%s2530_s30 + $0x80] sm:$0xff]  ;;  %v1127_v37 = vld [vmem:[%s2530_s30 + $0x90] sm:$0xff]  ;;  %v516_v39 = vld [vmem:[%s2463_s24 + $0x1d8] sm:$0xff]  ;;  %v1991_v42 = vpack.c.bf16 %v498_v34, %v497_v33 }
  0x41   : > { %2076 = vmatpush1.bf16.msra.mxu1 %v2075_v51  ;;  %1978 = vmatprep.subr.bf16.mxu0 %v1977_v52  ;;  %v515_v38 = vld [vmem:[%s2463_s24 + $0x1d0] sm:$0xff]  ;;  %v1130_v40 = vld [vmem:[%s2530_s30 + $0xa8] sm:$0xff]  ;;  %v1132_v41 = vld [vmem:[%s2530_s30 + $0xb8] sm:$0xff]  ;;  %v2091_v43 = vpack.c.bf16 %v1127_v37, %v1125_v35 }
  0x42   : > { %2078 = vmatprep.subr.bf16.mxu1 %v2077_v56  ;;  %654 = vmatprep.mubr.f32.mxu0 %v434_v62  ;;  %v1993_v44 = vpack.c.bf16 %v516_v39, %v515_v38  ;;  %v499_v45 = vld [vmem:[%s2463_s24 + $0x150] sm:$0xff]  ;;  %v500_v46 = vld [vmem:[%s2463_s24 + $0x158] sm:$0xff]  ;;  %v1129_v47 = vld [vmem:[%s2530_s30 + $0xa0] sm:$0xff]  ;;  %v2093_v48 = vpack.c.bf16 %v1132_v41, %v1130_v40 }
  0x43   : > { %655 = vmatmul.mubr.f32.gmra.mrb[2].mxu0 %v433_v0  ;;  %v1131_v49 = vld [vmem:[%s2530_s30 + $0xb0] sm:$0xff]  ;;  %v517_v50 = vld [vmem:[%s2463_s24 + $0x1e0] sm:$0xff]  ;;  %v518_v51 = vld [vmem:[%s2463_s24 + $0x1e8] sm:$0xff]  ;;  %v1995_v54 = vpack.c.bf16 %v500_v46, %v499_v45 }
  0x44   : > { %1980 = vmatpush3.bf16.msra.mxu0 %v1979_v63  ;;  %659 = vmatprep.mubr.f32.mxu0 %v442_v1  ;;  %v1134_v52 = vld [vmem:[%s2530_s30 + $0xc8] sm:$0xff]  ;;  %v1136_v53 = vld [vmem:[%s2530_s30 + $0xd8] sm:$0xff]  ;;  %v2095_v55 = vpack.c.bf16 %v1131_v49, %v1129_v47  ;;  %v1997_v56 = vpack.c.bf16 %v518_v51, %v517_v50  ;;  %v501_v57 = vld [vmem:[%s2463_s24 + $0x160] sm:$0xff] }
  0x45   : > { %2080 = vmatpush1.bf16.msra.mxu1 %v2079_v2  ;;  %1982 = vmatprep.subr.bf16.mxu0 %v1981_v3  ;;  %v502_v58 = vld [vmem:[%s2463_s24 + $0x168] sm:$0xff]  ;;  %v1133_v59 = vld [vmem:[%s2530_s30 + $0xc0] sm:$0xff]  ;;  %v2097_v60 = vpack.c.bf16 %v1136_v53, %v1134_v52  ;;  %v1135_v61 = vld [vmem:[%s2530_s30 + $0xd0] sm:$0xff] }
  0x46   : > { %2082 = vmatprep.subr.bf16.mxu1 %v2081_v7  ;;  %v519_v62 = vld [vmem:[%s2463_s24 + $0x1f0] sm:$0xff]  ;;  %v520_v63 = vld [vmem:[%s2463_s24 + $0x1f8] sm:$0xff]  ;;  %v1138_v0 = vld [vmem:[%s2530_s30 + $0xe8] sm:$0xff]  ;;  %v1999_v2 = vpack.c.bf16 %v502_v58, %v501_v57  ;;  %v2099_v5 = vpack.c.bf16 %v1135_v61, %v1133_v59 }
  0x47   : > { %660 = vmatmul.mubr.f32.gmra.mrb[4].mxu0 %v441_v15  ;;  %v1140_v1 = vld [vmem:[%s2530_s30 + $0xf8] sm:$0xff]  ;;  %v503_v3 = vld [vmem:[%s2463_s24 + $0x170] sm:$0xff]  ;;  %v2001_v6 = vpack.c.bf16 %v520_v63, %v519_v62  ;;  %v1137_v8 = vld [vmem:[%s2530_s30 + $0xe0] sm:$0xff] }
  0x48   : > { %1984 = vmatpush3.bf16.msra.mxu0 %v1983_v14  ;;  %664 = vmatprep.mubr.f32.mxu0 %v450_v16  ;;  %v440_v4 = vld [vmem:[%s3058_s3 + $0x78] sm:$0xff]  ;;  %v1139_v9 = vld [vmem:[%s2530_s30 + $0xf0] sm:$0xff]  ;;  %v2101_v10 = vpack.c.bf16 %v1140_v1, %v1138_v0  ;;  %v537_v11 = vld [vmem:[%s2463_s24 + $0x280] sm:$0xff] }
  0x49   : > { %2084 = vmatpush1.bf16.msra.mxu1 %v2083_v17  ;;  %1986 = vmatprep.subr.bf16.mxu0 %v1985_v18  ;;  %v504_v7 = vld [vmem:[%s2463_s24 + $0x178] sm:$0xff]  ;;  %v538_v12 = vld [vmem:[%s2463_s24 + $0x288] sm:$0xff]  ;;  %v439_v13 = vld [vmem:[%s3058_s3 + $0x70] sm:$0xff]  ;;  %v2103_v19 = vpack.c.bf16 %v1139_v9, %v1137_v8 }
  0x4a   : > { %2086 = vmatprep.subr.bf16.mxu1 %v2085_v22  ;;  %909 = vmatprep.mubr.f32.mxu1 %v440_v4  ;;  %v1142_v14 = vld [vmem:[%s2530_s30 + $0x108] sm:$0xff]  ;;  %v1144_v15 = vld [vmem:[%s2530_s30 + $0x118] sm:$0xff]  ;;  %v2003_v16 = vpack.c.bf16 %v504_v7, %v503_v3  ;;  %v521_v17 = vld [vmem:[%s2463_s24 + $0x200] sm:$0xff]  ;;  %v2005_v20 = vpack.c.bf16 %v538_v12, %v537_v11 }
  0x4b   : > { %665 = vmatmul.mubr.f32.gmra.mrb[6].mxu0 %v449_v29  ;;  %910 = vmatmul.mubr.f32.gmra.mrb[2].mxu1 %v439_v13  ;;  %v448_v18 = vld [vmem:[%s3058_s3 + $0xb8] sm:$0xff]  ;;  %v522_v21 = vld [vmem:[%s2463_s24 + $0x208] sm:$0xff]  ;;  %v1141_v22 = vld [vmem:[%s2530_s30 + $0x100] sm:$0xff]  ;;  %v2105_v24 = vpack.c.bf16 %v1144_v15, %v1142_v14 }
  0x4c   : > { %1988 = vmatpush3.bf16.msra.mxu0 %v1987_v28  ;;  %734 = vmatprep.mubr.f32.mxu0 %v428_v30  ;;  %v447_v23 = vld [vmem:[%s3058_s3 + $0xb0] sm:$0xff]  ;;  %v540_v27 = vld [vmem:[%s2463_s24 + $0x298] sm:$0xff]  ;;  %v1146_v28 = vld [vmem:[%s2530_s30 + $0x128] sm:$0xff] }
  0x4d   : > { %2088 = vmatpush1.bf16.msra.mxu1 %v2087_v31  ;;  %1990 = vmatprep.subr.bf16.mxu0 %v1989_v32  ;;  %v1143_v25 = vld [vmem:[%s2530_s30 + $0x110] sm:$0xff]  ;;  %v1148_v29 = vld [vmem:[%s2530_s30 + $0x138] sm:$0xff]  ;;  %v2007_v32 = vpack.c.bf16 %v522_v21, %v521_v17  ;;  %v1145_v38 = vld [vmem:[%s2530_s30 + $0x120] sm:$0xff] }
  0x4e   : > { %2090 = vmatprep.subr.bf16.mxu1 %v2089_v36  ;;  %v539_v26 = vld [vmem:[%s2463_s24 + $0x290] sm:$0xff]  ;;  %914 = vmatprep.mubr.f32.mxu1 %v448_v18  ;;  %v456_v30 = vld [vmem:[%s3058_s3 + $0xf8] sm:$0xff]  ;;  %v2107_v35 = vpack.c.bf16 %v1143_v25, %v1141_v22  ;;  %v2109_v40 = vpack.c.bf16 %v1148_v29, %v1146_v28  ;;  %v1094_v46 = vld [vmem:[%s3061_s6 + $0x8] sm:$0xff] }
  0x4f   : > { %915 = vmatmul.mubr.f32.gmra.mrb[4].mxu1 %v447_v23  ;;  %v427_v31 = vld [vmem:[%s3058_s3 + $0x10] sm:$0xff]  ;;  %v436_v33 = vld [vmem:[%s3058_s3 + $0x58] sm:$0xff]  ;;  %v2009_v36 = vpack.c.bf16 %v540_v27, %v539_v26  ;;  %v525_v52 = vld [vmem:[%s2463_s24 + $0x220] sm:$0xff] }
  0x50   : > { %1992 = vmatpush3.bf16.msra.mxu0 %v1991_v42  ;;  %v523_v34 = vld [vmem:[%s2463_s24 + $0x210] sm:$0xff]  ;;  %919 = vmatprep.mubr.f32.mxu1 %v456_v30  ;;  %v524_v37 = vld [vmem:[%s2463_s24 + $0x218] sm:$0xff]  ;;  %v541_v42 = vld [vmem:[%s2463_s24 + $0x2a0] sm:$0xff] }
  0x51   : > { %2092 = vmatpush1.bf16.msra.mxu1 %v2091_v43  ;;  %1994 = vmatprep.subr.bf16.mxu0 %v1993_v44  ;;  %v455_v39 = vld [vmem:[%s3058_s3 + $0xf0] sm:$0xff]  ;;  %v542_v43 = vld [vmem:[%s2463_s24 + $0x2a8] sm:$0xff]  ;;  %v1152_v45 = vld [vmem:[%s2530_s30 + $0x158] sm:$0xff] }
  0x52   : > { %2094 = vmatprep.subr.bf16.mxu1 %v2093_v48  ;;  %v1147_v41 = vld [vmem:[%s2530_s30 + $0x130] sm:$0xff]  ;;  %v1150_v44 = vld [vmem:[%s2530_s30 + $0x148] sm:$0xff]  ;;  %v2011_v48 = vpack.c.bf16 %v524_v37, %v523_v34  ;;  %v444_v49 = vld [vmem:[%s3058_s3 + $0x98] sm:$0xff]  ;;  %v2013_v51 = vpack.c.bf16 %v542_v43, %v541_v42 }
  0x53   : > { %920 = vmatmul.mubr.f32.gmra.mrb[6].mxu1 %v455_v39  ;;  %v435_v47 = vld [vmem:[%s3058_s3 + $0x50] sm:$0xff]  ;;  %v2111_v50 = vpack.c.bf16 %v1147_v41, %v1145_v38  ;;  %v526_v53 = vld [vmem:[%s2463_s24 + $0x228] sm:$0xff]  ;;  %v544_v58 = vld [vmem:[%s2463_s24 + $0x2b8] sm:$0xff] }
  0x54   : > { %1996 = vmatpush3.bf16.msra.mxu0 %v1995_v54  ;;  %v1149_v54 = vld [vmem:[%s2530_s30 + $0x140] sm:$0xff]  ;;  %v543_v57 = vld [vmem:[%s2463_s24 + $0x2b0] sm:$0xff]  ;;  %1301 = vmatprep.mubr.f32.mxu1 %v1094_v46  ;;  %v1154_v59 = vld [vmem:[%s2530_s30 + $0x168] sm:$0xff]  ;;  %v2015_v62 = vpack.c.bf16 %v526_v53, %v525_v52 }
  0x55   : > { %2096 = vmatpush1.bf16.msra.mxu1 %v2095_v55  ;;  %1998 = vmatprep.subr.bf16.mxu0 %v1997_v56  ;;  %v2113_v55 = vpack.c.bf16 %v1152_v45, %v1150_v44  ;;  %v1151_v56 = vld [vmem:[%s2530_s30 + $0x150] sm:$0xff]  ;;  %v452_v63 = vld [vmem:[%s3058_s3 + $0xd8] sm:$0xff]  ;;  %v2017_v1 = vpack.c.bf16 %v544_v58, %v543_v57  ;;  %v1153_v4 = vld [vmem:[%s2530_s30 + $0x160] sm:$0xff] }
  0x56   : > { %2098 = vmatprep.subr.bf16.mxu1 %v2097_v60  ;;  %v1156_v60 = vld [vmem:[%s2530_s30 + $0x178] sm:$0xff]  ;;  %v443_v61 = vld [vmem:[%s3058_s3 + $0x90] sm:$0xff]  ;;  %v2115_v0 = vpack.c.bf16 %v1151_v56, %v1149_v54  ;;  %v545_v7 = vld [vmem:[%s2463_s24 + $0x2c0] sm:$0xff] }
  0x57   : > { %v528_v3 = vld [vmem:[%s2463_s24 + $0x238] sm:$0xff]  ;;  %v546_v8 = vld [vmem:[%s2463_s24 + $0x2c8] sm:$0xff]  ;;  %v451_v11 = vld [vmem:[%s3058_s3 + $0xd0] sm:$0xff] }
  0x58   : > { %2000 = vmatpush3.bf16.msra.mxu0 %v1999_v2  ;;  %v527_v2 = vld [vmem:[%s2463_s24 + $0x230] sm:$0xff]  ;;  %v1158_v9 = vld [vmem:[%s2530_s30 + $0x188] sm:$0xff]  ;;  %v529_v13 = vld [vmem:[%s2463_s24 + $0x240] sm:$0xff]  ;;  %v2021_v15 = vpack.c.bf16 %v546_v8, %v545_v7 }
  0x59   : > { %2100 = vmatpush1.bf16.msra.mxu1 %v2099_v5  ;;  %2002 = vmatprep.subr.bf16.mxu0 %v2001_v6  ;;  %v2117_v5 = vpack.c.bf16 %v1156_v60, %v1154_v59  ;;  %v1155_v6 = vld [vmem:[%s2530_s30 + $0x170] sm:$0xff]  ;;  %v2019_v12 = vpack.c.bf16 %v528_v3, %v527_v2  ;;  %v1157_v17 = vld [vmem:[%s2530_s30 + $0x180] sm:$0xff]  ;;  %v430_v18 = vld [vmem:[%s3058_s3 + $0x28] sm:$0xff] }
  0x5a   : > { %2102 = vmatprep.subr.bf16.mxu1 %v2101_v10  ;;  %v1160_v10 = vld [vmem:[%s2530_s30 + $0x198] sm:$0xff]  ;;  %v2119_v14 = vpack.c.bf16 %v1155_v6, %v1153_v4  ;;  %v547_v21 = vld [vmem:[%s2463_s24 + $0x2d0] sm:$0xff]  ;;  %v1162_v23 = vld [vmem:[%s2530_s30 + $0x1a8] sm:$0xff] }
  0x5b   : > { %v548_v22 = vld [vmem:[%s2463_s24 + $0x2d8] sm:$0xff]  ;;  %v531_v28 = vld [vmem:[%s2463_s24 + $0x250] sm:$0xff]  ;;  %v1161_v30 = vld [vmem:[%s2530_s30 + $0x1a0] sm:$0xff] }
  0x5c   : > { %2004 = vmatpush3.bf16.msra.mxu0 %v2003_v16  ;;  %v530_v16 = vld [vmem:[%s2463_s24 + $0x248] sm:$0xff]  ;;  %v2025_v27 = vpack.c.bf16 %v548_v22, %v547_v21  ;;  %v532_v29 = vld [vmem:[%s2463_s24 + $0x258] sm:$0xff]  ;;  %v1165_v42 = vld [vmem:[%s2530_s30 + $0x1c0] sm:$0xff] }
  0x5d   : > { %2104 = vmatpush1.bf16.msra.mxu1 %v2103_v19  ;;  %2006 = vmatprep.subr.bf16.mxu0 %v2005_v20  ;;  %v2121_v19 = vpack.c.bf16 %v1160_v10, %v1158_v9  ;;  %v1159_v20 = vld [vmem:[%s2530_s30 + $0x190] sm:$0xff]  ;;  %v2023_v25 = vpack.c.bf16 %v530_v16, %v529_v13  ;;  %v550_v34 = vld [vmem:[%s2463_s24 + $0x2e8] sm:$0xff]  ;;  %v2027_v37 = vpack.c.bf16 %v532_v29, %v531_v28  ;;  %v552_v46 = vld [vmem:[%s2463_s24 + $0x2f8] sm:$0xff] }
  0x5e   : > { %2106 = vmatprep.subr.bf16.mxu1 %v2105_v24  ;;  %v1164_v24 = vld [vmem:[%s2530_s30 + $0x1b8] sm:$0xff]  ;;  %v2123_v26 = vpack.c.bf16 %v1159_v20, %v1157_v17  ;;  %v534_v41 = vld [vmem:[%s2463_s24 + $0x268] sm:$0xff]  ;;  %v1167_v44 = vld [vmem:[%s2530_s30 + $0x1d0] sm:$0xff] }
  0x5f   : > { %735 = vmatmul.mubr.f32.vlgmr.msra.gmra.mrb[8].mxu0 %v427_v31  ;;  %v2125_v31 = vpack.c.bf16 %v1164_v24, %v1162_v23  ;;  %v551_v45 = vld [vmem:[%s2463_s24 + $0x2f0] sm:$0xff]  ;;  %v536_v53 = vld [vmem:[%s2463_s24 + $0x278] sm:$0xff]  ;;  %v1169_v54 = vld [vmem:[%s2530_s30 + $0x1e0] sm:$0xff] }
  0x60   : > { %2008 = vmatpush3.bf16.msra.mxu0 %v2007_v32  ;;  %739 = vmatprep.mubr.f32.mxu0 %v436_v33  ;;  %v1163_v32 = vld [vmem:[%s2530_s30 + $0x1b0] sm:$0xff]  ;;  %v549_v33 = vld [vmem:[%s2463_s24 + $0x2e0] sm:$0xff]  ;;  %v990_v58 = vld [vmem:[%s3064_s9 + $0x8] sm:$0xff] }
  0x61   : > { %2108 = vmatpush1.bf16.msra.mxu1 %v2107_v35  ;;  %2010 = vmatprep.subr.bf16.mxu0 %v2009_v36  ;;  %v1166_v35 = vld [vmem:[%s2530_s30 + $0x1c8] sm:$0xff]  ;;  %v1168_v36 = vld [vmem:[%s2530_s30 + $0x1d8] sm:$0xff]  ;;  %v2127_v38 = vpack.c.bf16 %v1163_v32, %v1161_v30  ;;  %v2029_v39 = vpack.c.bf16 %v550_v34, %v549_v33  ;;  %v535_v52 = vld [vmem:[%s2463_s24 + $0x270] sm:$0xff] }
  0x62   : > { %2110 = vmatprep.subr.bf16.mxu1 %v2109_v40  ;;  %v533_v40 = vld [vmem:[%s2463_s24 + $0x260] sm:$0xff]  ;;  %v2129_v43 = vpack.c.bf16 %v1168_v36, %v1166_v35  ;;  %v1171_v56 = vld [vmem:[%s2530_s30 + $0x1f0] sm:$0xff]  ;;  %v1174_v59 = vld [vmem:[%s2530_s30 + $0x208] sm:$0xff]  ;;  %s1635_s24 = sshll.u32 %s2993_s13, 4  ;;  %s3008_s24 = int_to_ptr.vmem [resolvable:$true] %s1635_s24 }
  0x63   : > { %740 = vmatmul.mubr.f32.gmra.mrb[10].mxu0 %v435_v47  ;;  %v1170_v47 = vld [vmem:[%s2530_s30 + $0x1e8] sm:$0xff]  ;;  %v989_v57 = vld [vmem:[%s3064_s9] sm:$0xff]  ;;  %v1176_v60 = vld [vmem:[%s2530_s30 + $0x218] sm:$0xff]  ;;  %s2270_s29 = scalar_lea.vmem %s3008_s24, 1024 }
  0x64   : > { %2012 = vmatpush3.bf16.msra.mxu0 %v2011_v48  ;;  %744 = vmatprep.mubr.f32.mxu0 %v444_v49  ;;  %v1172_v48 = vld [vmem:[%s2530_s30 + $0x1f8] sm:$0xff]  ;;  %v2031_v49 = vpack.c.bf16 %v534_v41, %v533_v40  ;;  %v1175_v2 = vld [vmem:[%s2530_s30 + $0x210] sm:$0xff]  ;;  %v1178_v3 = vld [vmem:[%s2530_s30 + $0x228] sm:$0xff]  ;;  %p2271_p11 = scmp.ne.s32.totalorder %s3008_s24, %s2270_s29 }
  0x65   : > { %2112 = vmatpush1.bf16.msra.mxu1 %v2111_v50  ;;  %2014 = vmatprep.subr.bf16.mxu0 %v2013_v51  ;;  %v2131_v50 = vpack.c.bf16 %v1167_v44, %v1165_v42  ;;  %v2033_v51 = vpack.c.bf16 %v552_v46, %v551_v45  ;;  %v1180_v4 = vld [vmem:[%s2530_s30 + $0x238] sm:$0xff]  ;;  %v429_v6 = vld [vmem:[%s3058_s3 + $0x20] sm:$0xff]  ;;  %v926_v7 = vld [vmem:[%s3059_s4 + $0x8] sm:$0xff] }
  0x66   : > { %2114 = vmatprep.subr.bf16.mxu1 %v2113_v55  ;;  %v2133_v55 = vpack.c.bf16 %v1172_v48, %v1170_v47  ;;  %v1093_v8 = vld [vmem:[%s3061_s6] sm:$0xff]  ;;  %v438_v10 = vld [vmem:[%s3058_s3 + $0x68] sm:$0xff]  ;;  %v1179_v13 = vld [vmem:[%s2530_s30 + $0x230] sm:$0xff]  ;;  %936 = vperm.xlu1 %2269, %v926_v7   ;;  %p2272_p12 = pnand %p2271_p11, %p2437_p5 }
  0x67   : > { %745 = vmatmul.mubr.f32.gmra.mrb[12].mxu0 %v443_v61  ;;  %v2035_v61 = vpack.c.bf16 %v536_v53, %v535_v52  ;;  %v1098_v16 = vld [vmem:[%s3061_s6 + $0x28] sm:$0xff]  ;;  %v437_v17 = vld [vmem:[%s3058_s3 + $0x60] sm:$0xff]  ;;  %v1183_v24 = vld [vmem:[%s2530_s30 + $0x250] sm:$0xff] }
  0x68   : > { %2016 = vmatpush3.bf16.msra.mxu0 %v2015_v62  ;;  %749 = vmatprep.mubr.f32.mxu0 %v452_v63  ;;  %v2135_v62 = vpack.c.bf16 %v1171_v56, %v1169_v54  ;;  %v2069_v63 = vpack.c.bf16 %v990_v58, %v989_v57  ;;  %v446_v20 = vld [vmem:[%s3058_s3 + $0xa8] sm:$0xff]  ;;  %v1097_v21 = vld [vmem:[%s3061_s6 + $0x20] sm:$0xff]  ;;  %v927_v30 = vld [vmem:[%s3059_s4 + $0x10] sm:$0xff]  ;;  %p2273_p13 = pneg %p2272_p12 }
  0x69   : > { %2116 = vmatpush1.bf16.msra.mxu1 %v2115_v0  ;;  %2018 = vmatprep.subr.bf16.mxu0 %v2017_v1  ;;  %v2137_v0 = vpack.c.bf16 %v1176_v60, %v1174_v59  ;;  %v1173_v1 = vld [vmem:[%s2530_s30 + $0x200] sm:$0xff]  ;;  %v954_v28 = vld [vmem:[%s3060_s5 + $0x8] sm:$0xff]  ;;  %v1187_v36 = vld [vmem:[%s2530_s30 + $0x270] sm:$0xff] }
  0x6a   : > { %2118 = vmatprep.subr.bf16.mxu1 %v2117_v5  ;;  %v925_v5 = vld [vmem:[%s3059_s4] sm:$0xff]  ;;  %v2139_v9 = vpack.c.bf16 %v1175_v2, %v1173_v1  ;;  %v454_v32 = vld [vmem:[%s3058_s3 + $0xe8] sm:$0xff]  ;;  %964 = vperm.xlu1 %2269, %v954_v28   ;;  %v955_v40 = vld [vmem:[%s3060_s5 + $0x10] sm:$0xff] }
  0x6b   : > { %750 = vmatmul.mubr.f32.gmra.mrb[14].mxu0 %v451_v11  ;;  %931 = vperm.xlu0 %2268, %v925_v5   ;;  %v2141_v11 = vpack.c.bf16 %v1180_v4, %v1178_v3  ;;  %v1181_v23 = vld [vmem:[%s2530_s30 + $0x240] sm:$0xff]  ;;  %v928_v42 = vld [vmem:[%s3059_s4 + $0x18] sm:$0xff]  ;;  %v1191_v48 = vld [vmem:[%s2530_s30 + $0x290] sm:$0xff] }
  0x6c   : > { %2020 = vmatpush3.bf16.msra.mxu0 %v2019_v12  ;;  %819 = vmatprep.mubr.f32.mxu0 %v430_v18  ;;  %v1177_v12 = vld [vmem:[%s2530_s30 + $0x220] sm:$0xff]  ;;  %v956_v52 = vld [vmem:[%s3060_s5 + $0x18] sm:$0xff]  ;;  %v986_v53 = vld [vmem:[%s2810_s25 + $0x8] sm:$0xff] }
  0x6d   : > { %2120 = vmatpush1.bf16.msra.mxu1 %v2119_v14  ;;  %2022 = vmatprep.subr.bf16.mxu0 %v2021_v15  ;;  %v1182_v14 = vld [vmem:[%s2530_s30 + $0x248] sm:$0xff]  ;;  %v1184_v15 = vld [vmem:[%s2530_s30 + $0x258] sm:$0xff]  ;;  %v953_v18 = vld [vmem:[%s3060_s5] sm:$0xff] }
  0x6e   : > { %2122 = vmatprep.subr.bf16.mxu1 %v2121_v19  ;;  %v2143_v19 = vpack.c.bf16 %v1179_v13, %v1177_v12  ;;  %v2145_v22 = vpack.c.bf16 %v1184_v15, %v1182_v14  ;;  %v445_v29 = vld [vmem:[%s3058_s3 + $0xa0] sm:$0xff]  ;;  %969 = vperm.xlu1 %2269, %v955_v40   ;;  %v987_v56 = vld [vmem:[%s2810_s25 + $0x10] sm:$0xff]  ;;  %v1198_v60 = vld [vmem:[%s2530_s30 + $0x2c8] sm:$0xff] }
  0x6f   : > { %959 = vperm.xlu0 %2268, %v953_v18   ;;  %v1101_v33 = vld [vmem:[%s3061_s6 + $0x40] sm:$0xff]  ;;  %v1195_v59 = vld [vmem:[%s2530_s30 + $0x2b0] sm:$0xff]  ;;  %v1202_v5 = vld [vmem:[%s2530_s30 + $0x2e8] sm:$0xff] }
  0x70   : > { %2024 = vmatpush3.bf16.msra.mxu0 %v2023_v25  ;;  %v1102_v25 = vld [vmem:[%s3061_s6 + $0x48] sm:$0xff]  ;;  %v1185_v35 = vld [vmem:[%s2530_s30 + $0x260] sm:$0xff]  ;;  %v1199_v4 = vld [vmem:[%s2530_s30 + $0x2d0] sm:$0xff] }
  0x71   : > { %2124 = vmatpush1.bf16.msra.mxu1 %v2123_v26  ;;  %2026 = vmatprep.subr.bf16.mxu0 %v2025_v27  ;;  %v1186_v26 = vld [vmem:[%s2530_s30 + $0x268] sm:$0xff]  ;;  %v1188_v27 = vld [vmem:[%s2530_s30 + $0x278] sm:$0xff]  ;;  %v453_v41 = vld [vmem:[%s3058_s3 + $0xe0] sm:$0xff] }
  0x72   : > { %2126 = vmatprep.subr.bf16.mxu1 %v2125_v31  ;;  %v2147_v31 = vpack.c.bf16 %v1183_v24, %v1181_v23  ;;  %v2149_v34 = vpack.c.bf16 %v1188_v27, %v1186_v26  ;;  %v985_v44 = vld [vmem:[%s2810_s25] sm:$0xff]  ;;  %974 = vperm.xlu1 %2269, %v956_v52   ;;  %v1418_v7 = vld [vmem:[%s3062_s7 + $0x18] sm:$0xff]  ;;  %v1203_v12 = vld [vmem:[%s2530_s30 + $0x2f0] sm:$0xff] }
  0x73   : > { %941 = vperm.xlu0 %2268, %v927_v30   ;;  %v1105_v45 = vld [vmem:[%s3061_s6 + $0x60] sm:$0xff]  ;;  %v1206_v13 = vld [vmem:[%s2530_s30 + $0x308] sm:$0xff]  ;;  %v1208_v14 = vld [vmem:[%s2530_s30 + $0x318] sm:$0xff] }
  0x74   : > { %2028 = vmatpush3.bf16.msra.mxu0 %v2027_v37  ;;  %v1106_v37 = vld [vmem:[%s3061_s6 + $0x68] sm:$0xff]  ;;  %v1189_v47 = vld [vmem:[%s2530_s30 + $0x280] sm:$0xff]  ;;  %v2169_v18 = vpack.c.bf16 %v1208_v14, %v1206_v13  ;;  %v1450_v23 = vld [vmem:[%s3063_s8 + $0x18] sm:$0xff] }
  0x75   : > { %2128 = vmatpush1.bf16.msra.mxu1 %v2127_v38  ;;  %2030 = vmatprep.subr.bf16.mxu0 %v2029_v39  ;;  %v1190_v38 = vld [vmem:[%s2530_s30 + $0x288] sm:$0xff]  ;;  %v1192_v39 = vld [vmem:[%s2530_s30 + $0x298] sm:$0xff]  ;;  %v1415_v54 = vld [vmem:[%s3062_s7] sm:$0xff] }
  0x76   : > { %2130 = vmatprep.subr.bf16.mxu1 %v2129_v43  ;;  %v2151_v43 = vpack.c.bf16 %v1187_v36, %v1185_v35  ;;  %v2153_v46 = vpack.c.bf16 %v1192_v39, %v1190_v38  ;;  %v1193_v58 = vld [vmem:[%s2530_s30 + $0x2a0] sm:$0xff]  ;;  %v1448_v15 = vld [vmem:[%s3063_s8 + $0x8] sm:$0xff]  ;;  %v1211_v27 = vld [vmem:[%s2530_s30 + $0x330] sm:$0xff] }
  0x77   : > { %946 = vperm.xlu0 %2268, %v928_v42   ;;  %v2159_v1 = vpack.c.bf16 %v1195_v59, %v1193_v58  ;;  %v1197_v3 = vld [vmem:[%s2530_s30 + $0x2c0] sm:$0xff]  ;;  %v1214_v28 = vld [vmem:[%s2530_s30 + $0x348] sm:$0xff]  ;;  %v1220_v35 = vld [vmem:[%s2530_s30 + $0x378] sm:$0xff] }
  0x78   : > { %2032 = vmatpush3.bf16.msra.mxu0 %v2031_v49  ;;  %v1096_v49 = vld [vmem:[%s3061_s6 + $0x18] sm:$0xff]  ;;  %v1209_v26 = vld [vmem:[%s2530_s30 + $0x320] sm:$0xff]  ;;  %v1219_v39 = vld [vmem:[%s2530_s30 + $0x370] sm:$0xff] }
  0x79   : > { %2132 = vmatpush1.bf16.msra.mxu1 %v2131_v50  ;;  %2034 = vmatprep.subr.bf16.mxu0 %v2033_v51  ;;  %v1194_v50 = vld [vmem:[%s2530_s30 + $0x2a8] sm:$0xff]  ;;  %v1196_v51 = vld [vmem:[%s2530_s30 + $0x2b8] sm:$0xff]  ;;  %v2175_v30 = vpack.c.bf16 %v1211_v27, %v1209_v26  ;;  %v1217_v38 = vld [vmem:[%s2530_s30 + $0x360] sm:$0xff] }
  0x7a   : > { %2134 = vmatprep.subr.bf16.mxu1 %v2133_v55  ;;  %v2155_v55 = vpack.c.bf16 %v1191_v48, %v1189_v47  ;;  %v2157_v57 = vpack.c.bf16 %v1196_v51, %v1194_v50  ;;  %v1222_v40 = vld [vmem:[%s2530_s30 + $0x388] sm:$0xff]  ;;  %v2183_v42 = vpack.c.bf16 %v1219_v39, %v1217_v38  ;;  %v1228_v47 = vld [vmem:[%s2530_s30 + $0x3b8] sm:$0xff]  ;;  %v1225_v50 = vld [vmem:[%s2530_s30 + $0x3a0] sm:$0xff] }
  0x7b   : > { %1421 = vperm.xlu0 %2268, %v1415_v54   ;;  %v1227_v51 = vld [vmem:[%s2530_s30 + $0x3b0] sm:$0xff]  ;;  %v1230_v52 = vld [vmem:[%s2530_s30 + $0x3c8] sm:$0xff]  ;;  %v1236_v59 = vld [vmem:[%s2530_s30 + $0x3f8] sm:$0xff] }
  0x7c   : > { %2036 = vmatpush3.bf16.msra.mxu0 %v2035_v61  ;;  %v1200_v61 = vld [vmem:[%s2530_s30 + $0x2d8] sm:$0xff]  ;;  %v2191_v54 = vpack.c.bf16 %v1227_v51, %v1225_v50  ;;  %v1234_v58 = vld [vmem:[%s2530_s30 + $0x3e8] sm:$0xff] }
  0x7d   : > { %2136 = vmatpush1.bf16.msra.mxu1 %v2135_v62  ;;  %2070 = vmatprep.subr.bf16.mxu0 %v2069_v63  ;;  %v1416_v62 = vld [vmem:[%s3062_s7 + $0x8] sm:$0xff]  ;;  %v2161_v2 = vpack.c.bf16 %v1200_v61, %v1198_v60  ;;  %v2197_v61 = vpack.c.bf16 %v1236_v59, %v1234_v58  ;;  %v1502_v27 = vld [vmem:[%s3065_s10 + $0x78] sm:$0xff] }
  0x7e   : > { %2138 = vmatprep.subr.bf16.mxu1 %v2137_v0  ;;  %v1417_v0 = vld [vmem:[%s3062_s7 + $0x10] sm:$0xff]  ;;  %1426 = vperm.xlu1 %2269, %v1416_v62   ;;  %v1233_v62 = vld [vmem:[%s2530_s30 + $0x3e0] sm:$0xff]  ;;  %v1492_v14 = vld [vmem:[%s3065_s10 + $0x28] sm:$0xff] }
  0x7f   : > { %820 = vmatmul.mubr.f32.vlgmr.msra.gmra.mrb[16].mxu0 %v429_v6  ;;  %v1204_v6 = vld [vmem:[%s2530_s30 + $0x2f8] sm:$0xff]  ;;  %1431 = vperm.xlu0 %2268, %v1417_v0   ;;  %v1500_v26 = vld [vmem:[%s3065_s10 + $0x68] sm:$0xff] }
  0x80   : > { %2072 = vmatpush3.bf16.msra.mxu0 %v2069_v63  ;;  %1302 = vmatmul.mubr.f32.vlgmr.msra.gmra.mrb[8].mxu1 %v1093_v8  ;;  %v988_v63 = vld [vmem:[%s2810_s25 + $0x18] sm:$0xff]  ;;  %v1447_v8 = vld [vmem:[%s3063_s8] sm:$0xff]  ;;  %s2336_s25 = smov [#allocation2]  }
  0x81   : > { %2140 = vmatpush1.bf16.msra.mxu1 %v2139_v9  ;;  %824 = vmatprep.mubr.f32.mxu0 %v438_v10  ;;  %v2163_v9 = vpack.c.bf16 %v1199_v4, %v1197_v3  ;;  %v2165_v10 = vpack.c.bf16 %v1204_v6, %v1202_v5  ;;  %v1099_v3 = vld [vmem:[%s3061_s6 + $0x30] sm:$0xff]  ;;  %v1104_v4 = vld [vmem:[%s3061_s6 + $0x58] sm:$0xff]  ;;  %s2274_s14 = sshll.u32 %s2336_s25, 4  ;;  %s2275_s14 = int_to_ptr.vmem [resolvable:$false] %s2274_s14 }
  0x82   : > { %2142 = vmatprep.subr.bf16.mxu1 %v2141_v11  ;;  %1307 = vmatprep.mubr.f32.mxu1 %v1098_v16  ;;  %v1201_v11 = vld [vmem:[%s2530_s30 + $0x2e0] sm:$0xff]  ;;  %v1449_v16 = vld [vmem:[%s3063_s8 + $0x10] sm:$0xff]  ;;  %v1108_v6 = vld [vmem:[%s3061_s6 + $0x78] sm:$0xff]  ;;  %s2276_s15 = scalar_lea.vmem %s2275_s14, 2048  ;;  %p2277_p0 = scmp.lt.s32.totalorder %s3008_s24, %s2275_s14 }
  0x83   : > { %825 = vmatmul.mubr.f32.gmra.mrb[18].mxu0 %v437_v17  ;;  %1436 = vperm.xlu1 %2269, %v1418_v7   ;;  %v2167_v17 = vpack.c.bf16 %v1203_v12, %v1201_v11  ;;  %v1103_v5 = vld [vmem:[%s3061_s6 + $0x50] sm:$0xff]  ;;  %v1487_v11 = vld [vmem:[%s3065_s10] sm:$0xff]  ;;  %p2278_p1 = scmp.lt.s32.totalorder %s2276_s15, %s2270_s29 }
  0x84   : > { %829 = vmatprep.mubr.f32.mxu0 %v446_v20  ;;  %1308 = vmatmul.mubr.f32.gmra.mrb[10].mxu1 %v1097_v21  ;;  %v1207_v20 = vld [vmem:[%s2530_s30 + $0x310] sm:$0xff]  ;;  %v1210_v21 = vld [vmem:[%s2530_s30 + $0x328] sm:$0xff] }
  0x85   : > { %2144 = vmatpush1.bf16.msra.mxu1 %v2143_v19  ;;  %1313 = vmatprep.mubr.f32.mxu1 %v1102_v25  ;;  %v1205_v19 = vld [vmem:[%s2530_s30 + $0x300] sm:$0xff]  ;;  %v1107_v7 = vld [vmem:[%s3061_s6 + $0x70] sm:$0xff]  ;;  %p2279_p2 = por %p2278_p1, %p2277_p0 }
  0x86   : > { %2146 = vmatprep.subr.bf16.mxu1 %v2145_v22  ;;  %1453 = vperm.xlu0 %2268, %v1447_v8   ;;  %v1212_v22 = vld [vmem:[%s2530_s30 + $0x338] sm:$0xff]  ;;  %v2171_v24 = vpack.c.bf16 %v1207_v20, %v1205_v19  ;;  %v1488_v8 = vld [vmem:[%s3065_s10 + $0x8] sm:$0xff]  ;;  %v1489_v12 = vld [vmem:[%s3065_s10 + $0x10] sm:$0xff] }
  0x87   : > { %830 = vmatmul.mubr.f32.gmra.mrb[20].mxu0 %v445_v29  ;;  %1458 = vperm.xlu1 %2269, %v1448_v15   ;;  %v2173_v25 = vpack.c.bf16 %v1212_v22, %v1210_v21  ;;  %v1216_v29 = vld [vmem:[%s2530_s30 + $0x358] sm:$0xff]  ;;  %v2203_v13 = vpack.c.bf16 %v1489_v12, %v1487_v11  ;;  %v1496_v20 = vld [vmem:[%s3065_s10 + $0x48] sm:$0xff]  ;;  %p2280_p3 = pnand %p2279_p2, %p2273_p13 }
  0x88   : > { %834 = vmatprep.mubr.f32.mxu0 %v454_v32  ;;  %1314 = vmatmul.mubr.f32.gmra.mrb[12].mxu1 %v1101_v33  ;;  %v1213_v32 = vld [vmem:[%s2530_s30 + $0x340] sm:$0xff]  ;;  %v1215_v33 = vld [vmem:[%s2530_s30 + $0x350] sm:$0xff]  ;;  %v1494_v15 = vld [vmem:[%s3065_s10 + $0x38] sm:$0xff] }
  0x89   : > { %2148 = vmatpush1.bf16.msra.mxu1 %v2147_v31  ;;  %1319 = vmatprep.mubr.f32.mxu1 %v1106_v37  ;;  %v2177_v31 = vpack.c.bf16 %v1216_v29, %v1214_v28  ;;  %v2179_v36 = vpack.c.bf16 %v1215_v33, %v1213_v32  ;;  %v1498_v21 = vld [vmem:[%s3065_s10 + $0x58] sm:$0xff]  ;;  %v2213_v28 = vpack.c.bf16 %v1502_v27, %v1500_v26  ;;  %v1499_v29 = vld [vmem:[%s3065_s10 + $0x60] sm:$0xff]  ;;  %v2335_v32 = vmov 0.0  }
  0x8a   : > { %2150 = vmatprep.subr.bf16.mxu1 %v2149_v34  ;;  %1463 = vperm.xlu0 %2268, %v1449_v16   ;;  %v1218_v34 = vld [vmem:[%s2530_s30 + $0x368] sm:$0xff]  ;;  %v2205_v16 = vpack.c.bf16 %v1494_v15, %v1492_v14  ;;  %v2209_v22 = vpack.c.bf16 %v1498_v21, %v1496_v20 }
  0x8b   : > { %835 = vmatmul.mubr.f32.gmra.mrb[22].mxu0 %v453_v41  ;;  %1468 = vperm.xlu1 %2269, %v1450_v23   ;;  %v2181_v37 = vpack.c.bf16 %v1220_v35, %v1218_v34  ;;  %v1224_v41 = vld [vmem:[%s2530_s30 + $0x398] sm:$0xff]  ;;  %v1495_v23 = vld [vmem:[%s3065_s10 + $0x40] sm:$0xff] }
  0x8c   : > { %1935 = vmatprep.mubr.msk.f32.mxu0 %vm991_vm0, %v985_v44  ;;  %1320 = vmatmul.mubr.f32.gmra.mrb[14].mxu1 %v1105_v45  ;;  %v1221_v44 = vld [vmem:[%s2530_s30 + $0x380] sm:$0xff]  ;;  %v1223_v45 = vld [vmem:[%s2530_s30 + $0x390] sm:$0xff] }
  0x8d   : > { %2152 = vmatpush1.bf16.msra.mxu1 %v2151_v43  ;;  %1390 = vmatprep.mubr.f32.mxu1 %v1096_v49  ;;  %v2185_v43 = vpack.c.bf16 %v1224_v41, %v1222_v40  ;;  %v2187_v48 = vpack.c.bf16 %v1223_v45, %v1221_v44 }
  0x8e   : > { %2154 = vmatprep.subr.bf16.mxu1 %v2153_v46  ;;  %v1226_v46 = vld [vmem:[%s2530_s30 + $0x3a8] sm:$0xff] }
  0x8f   : > { %1936 = vmatmul.mubr.msk.f32.vlgmr.msra.gmra.mrb[24].mxu0 %vm991_vm0, %v986_v53  ;;  %v2189_v49 = vpack.c.bf16 %v1228_v47, %v1226_v46  ;;  %v1232_v53 = vld [vmem:[%s2530_s30 + $0x3d8] sm:$0xff] }
  0x90   : > { %1938 = vmatprep.mubr.msk.f32.mxu0 %vm991_vm0, %v987_v56  ;;  %v1229_v56 = vld [vmem:[%s2530_s30 + $0x3c0] sm:$0xff] }
  0x91   : > { %2156 = vmatpush1.bf16.msra.mxu1 %v2155_v55  ;;  %v2193_v55 = vpack.c.bf16 %v1232_v53, %v1230_v52 }
  0x92   : > { %2158 = vmatprep.subr.bf16.mxu1 %v2157_v57  ;;  %v1231_v57 = vld [vmem:[%s2530_s30 + $0x3d0] sm:$0xff] }
  0x93   : > { %1939 = vmatmul.mubr.msk.f32.gmra.mrb[26].mxu0 %vm991_vm0, %v988_v63  ;;  %v2195_v60 = vpack.c.bf16 %v1231_v57, %v1229_v56  ;;  %v1235_v63 = vld [vmem:[%s2530_s30 + $0x3f0] sm:$0xff] }
  0x94   : > { %v2199_v0 = vpack.c.bf16 %v1235_v63, %v1233_v62  ;;  %1580 = vmatprep.mubr.f32.mxu0 %v2335_v32 }
  0x95   : > { %2160 = vmatpush1.bf16.msra.mxu1 %v2159_v1  ;;  %v1095_v1 = vld [vmem:[%s3061_s6 + $0x10] sm:$0xff] }
  0x96   : > { %2162 = vmatprep.subr.bf16.mxu1 %v2161_v2  ;;  %v1100_v2 = vld [vmem:[%s3061_s6 + $0x38] sm:$0xff] }
  0x99   : > { %2164 = vmatpush1.bf16.msra.mxu1 %v2163_v9  ;;  %v1490_v9 = vld [vmem:[%s3065_s10 + $0x18] sm:$0xff] }
  0x9a   : > { %2166 = vmatprep.subr.bf16.mxu1 %v2165_v10  ;;  %v2201_v10 = vpack.c.bf16 %v1490_v9, %v1488_v8 }
  0x9c   : > { %2202 = vmatprep.subr.bf16.mxu0 %v2201_v10 }
  0x9d   : > { %2168 = vmatpush1.bf16.msra.mxu1 %v2167_v17  ;;  %2204 = vmatpush1.bf16.msra.mxu0 %v2203_v13  ;;  %v1491_v17 = vld [vmem:[%s3065_s10 + $0x20] sm:$0xff] }
  0x9e   : > { %2170 = vmatprep.subr.bf16.mxu1 %v2169_v18  ;;  %v1493_v18 = vld [vmem:[%s3065_s10 + $0x30] sm:$0xff]  ;;  %2206 = vmatprep.subr.bf16.mxu0 %v2205_v16 }
  0x9f   : > { %v2207_v19 = vpack.c.bf16 %v1493_v18, %v1491_v17 }
  0xa1   : > { %2172 = vmatpush1.bf16.msra.mxu1 %v2171_v24  ;;  %2208 = vmatpush1.bf16.msra.mxu0 %v2207_v19  ;;  %v1497_v24 = vld [vmem:[%s3065_s10 + $0x50] sm:$0xff] }
  0xa2   : > { %2174 = vmatprep.subr.bf16.mxu1 %v2173_v25  ;;  %v2211_v25 = vpack.c.bf16 %v1497_v24, %v1495_v23  ;;  %2210 = vmatprep.subr.bf16.mxu0 %v2209_v22 }
  0xa5   : > { %2176 = vmatpush1.bf16.msra.mxu1 %v2175_v30  ;;  %2212 = vmatpush1.bf16.msra.mxu0 %v2211_v25  ;;  %v1501_v30 = vld [vmem:[%s3065_s10 + $0x70] sm:$0xff] }
  0xa6   : > { %2178 = vmatprep.subr.bf16.mxu1 %v2177_v31  ;;  %v2215_v31 = vpack.c.bf16 %v1501_v30, %v1499_v29  ;;  %2214 = vmatprep.subr.bf16.mxu0 %v2213_v28 }
  0xa9   : > { %2180 = vmatpush1.bf16.msra.mxu1 %v2179_v36  ;;  %2216 = vmatpush1.bf16.msra.mxu0 %v2215_v31 }
  0xaa   : > { %2182 = vmatprep.subr.bf16.mxu1 %v2181_v37 }
  0xad   : > { %2184 = vmatpush1.bf16.msra.mxu1 %v2183_v42 }
  0xae   : > { %2186 = vmatprep.subr.bf16.mxu1 %v2185_v43 }
  0xb1   : > { %2188 = vmatpush1.bf16.msra.mxu1 %v2187_v48 }
  0xb2   : > { %2190 = vmatprep.subr.bf16.mxu1 %v2189_v49 }
  0xb5   : > { %2192 = vmatpush1.bf16.msra.mxu1 %v2191_v54 }
  0xb6   : > { %2194 = vmatprep.subr.bf16.mxu1 %v2193_v55 }
  0xb9   : > { %2196 = vmatpush1.bf16.msra.mxu1 %v2195_v60 }
  0xba   : > { %2198 = vmatprep.subr.bf16.mxu1 %v2197_v61 }
  0xbd   : > { %2200 = vmatpush1.bf16.msra.mxu1 %v2199_v0 }
  0xc0   : > { %1391 = vmatmul.mubr.f32.vlgmr.msra.gmra.mrb[8].mxu1 %v1095_v1 }
  0xc1   : > { %1396 = vmatprep.mubr.f32.mxu1 %v1100_v2 }
  0xc4   : > { %1397 = vmatmul.mubr.f32.gmra.mrb[10].mxu1 %v1099_v3 }
  0xc5   : > { %1402 = vmatprep.mubr.f32.mxu1 %v1104_v4 }
  0xc8   : > { %1403 = vmatmul.mubr.f32.gmra.mrb[12].mxu1 %v1103_v5 }
  0xc9   : > { %1408 = vmatprep.mubr.f32.mxu1 %v1108_v6 }
  0xcc   : > { %1409 = vmatmul.mubr.f32.gmra.mrb[14].mxu1 %v1107_v7 }
  0xe5   : > { %v937_v13 = vpop.permute.xlu1 %936 }
  0xe9   : > { %v965_v23 = vpop.permute.xlu1 %964 }
  0xea   : > { %v932_v10 = vpop.permute.xlu0 %931 }
  0xee   : > { %v960_v19 = vpop.permute.xlu0 %959 }
  0xf2   : > { %v942_v31 = vpop.permute.xlu0 %941 }
 0x112   : > { %v1781_v33 = vpop.f32.mrb[0].mxu0 }
 0x113   : > { %v1782_v34 = vpop.f32.mrb[1].mxu0  ;;  %v1913_v35 = vpop.f32.mrb[0].mxu1 }
 0x114   : > { %v1783_v36 = vadd.f32 %v1782_v34, %v1781_v33  ;;  %v1914_v37 = vpop.f32.mrb[1].mxu1 }
 0x115   : > { %v1915_v38 = vadd.f32 %v1914_v37, %v1913_v35  ;;  %v970_v37 = vpop.permute.xlu1 %969 }
 0x116   : > { %v1784_v39 = vpop.f32.mrb[2].mxu0 }
 0x117   : > { %v1785_v40 = vpop.f32.mrb[3].mxu0 }
 0x118   : > { %v1786_v41 = vadd.f32 %v1785_v40, %v1784_v39 }
 0x11a   : > { %v1787_v42 = vpop.f32.mrb[4].mxu0 }
 0x11b   : > { %v1788_v43 = vpop.f32.mrb[5].mxu0 }
 0x11c   : > { %v1789_v44 = vadd.f32 %v1788_v43, %v1787_v42 }
 0x11e   : > { %v1790_v45 = vpop.f32.mrb[6].mxu0  ;;  %v1916_v48 = vpop.f32.mrb[2].mxu1 }
 0x11f   : > { %v1791_v46 = vpop.f32.mrb[7].mxu0  ;;  %v1917_v49 = vpop.f32.mrb[3].mxu1 }
 0x120   : > { %v1792_v47 = vadd.f32 %v1791_v46, %v1790_v45  ;;  %v1918_v50 = vadd.f32 %v1917_v49, %v1916_v48  ;;  %v947_v48 = vpop.permute.xlu0 %946 }
 0x122   : > { %v1919_v51 = vpop.f32.mrb[4].mxu1 }
 0x123   : > { %v1920_v52 = vpop.f32.mrb[5].mxu1 }
 0x124   : > { %v1921_v53 = vadd.f32 %v1920_v52, %v1919_v51  ;;  %v975_v52 = vpop.permute.xlu1 %974 }
 0x126   : > { %v1922_v55 = vpop.f32.mrb[6].mxu1 }
 0x127   : > { %v1923_v57 = vpop.f32.mrb[7].mxu1 }
 0x128   : > { %v1924_v59 = vadd.f32 %v1923_v57, %v1922_v55 }
 0x132   : > { %v1825_v54 = vpop.f32.mrb[8].mxu0 }
 0x133   : > { %v1826_v56 = vpop.f32.mrb[9].mxu0 }
 0x134   : > { %v1827_v58 = vadd.f32 %v1826_v56, %v1825_v54 }
 0x136   : > { %v737_v60 = vadd.f32 %v1827_v58, %v1783_v36  ;;  %v1828_v61 = vpop.f32.mrb[10].mxu0 }
 0x137   : > { %v1829_v62 = vpop.f32.mrb[11].mxu0 }
 0x138   : > { %v1830_v63 = vadd.f32 %v1829_v62, %v1828_v61 }
 0x13a   : > { %v742_v0 = vadd.f32 %v1830_v63, %v1786_v41  ;;  %v1831_v1 = vpop.f32.mrb[12].mxu0 }
 0x13b   : > { %v1832_v2 = vpop.f32.mrb[13].mxu0 }
 0x13c   : > { %v1833_v3 = vadd.f32 %v1832_v2, %v1831_v1  ;;  %v1422_v2 = vpop.permute.xlu0 %1421 }
 0x13e   : > { %v747_v4 = vadd.f32 %v1833_v3, %v1789_v44  ;;  %v1834_v5 = vpop.f32.mrb[14].mxu0  ;;  %v1427_v3 = vpop.permute.xlu1 %1426 }
 0x13f   : > { %v1835_v6 = vpop.f32.mrb[15].mxu0 }
 0x140   : > { %v1836_v7 = vadd.f32 %v1835_v6, %v1834_v5 }
 0x142   : > { %v752_v8 = vadd.f32 %v1836_v7, %v1792_v47  ;;  %v1437_v6 = vpop.permute.xlu1 %1436 }
 0x152   : > { %v1869_v9 = vpop.f32.mrb[16].mxu0 }
 0x153   : > { %v1870_v11 = vpop.f32.mrb[17].mxu0 }
 0x154   : > { %v1871_v12 = vadd.f32 %v1870_v11, %v1869_v9 }
 0x156   : > { %v822_v14 = vadd.f32 %v1871_v12, %v737_v60  ;;  %v1872_v15 = vpop.f32.mrb[18].mxu0  ;;  %v1459_v12 = vpop.permute.xlu1 %1458 }
 0x157   : > { %v1873_v16 = vpop.f32.mrb[19].mxu0 }
 0x158   : > { %v907_v17 = vadd.f32 %v1915_v38, %v822_v14  ;;  %v1874_v18 = vadd.f32 %v1873_v16, %v1872_v15 }
 0x15a   : > { %v949_v20 = vmul.f32 %v932_v10, %v907_v17  ;;  %v827_v21 = vadd.f32 %v1874_v18, %v742_v0  ;;  %v1875_v22 = vpop.f32.mrb[20].mxu0 }
 0x15b   : > { %v1876_v24 = vpop.f32.mrb[21].mxu0 }
 0x15c   : > { %v912_v25 = vadd.f32 %v1918_v50, %v827_v21  ;;  %v1877_v26 = vadd.f32 %v1876_v24, %v1875_v22  ;;  %v977_v30 = vadd.f32 %v960_v19, %v949_v20 }
 0x15e   : > { %v950_v27 = vmul.f32 %v937_v13, %v912_v25  ;;  %v832_v28 = vadd.f32 %v1877_v26, %v747_v4  ;;  %v1878_v29 = vpop.f32.mrb[22].mxu0  ;;  %v981_v42 = vmax.f32 %v977_v30, 0.0  ;;  %v1432_v4 = vpop.permute.xlu0 %1431 }
 0x15f   : > { %v1879_v33 = vpop.f32.mrb[23].mxu0 }
 0x160   : > { %v917_v34 = vadd.f32 %v1921_v53, %v832_v28  ;;  %v1880_v35 = vadd.f32 %v1879_v33, %v1878_v29  ;;  %v978_v36 = vadd.f32 %v965_v23, %v950_v27 }
 0x162   : > { %v951_v38 = vmul.f32 %v942_v31, %v917_v34  ;;  %v837_v39 = vadd.f32 %v1880_v35, %v752_v8  ;;  %v982_v40 = vmax.f32 %v978_v36, 0.0  ;;  %v1937_v41 = vpop.f32.mrb[24].mxu0  ;;  %v1454_v8 = vpop.permute.xlu0 %1453 }
 0x163   : > { %v1070_v43 = vpop.f32.mrb[25].mxu0  ;;  %v1469_v34 = vpop.permute.xlu1 %1468 }
 0x164   : > { %v922_v44 = vadd.f32 %v1924_v59, %v837_v39  ;;  %v1090_v45 = vadd.f32 %v1937_v41, %v982_v40  ;;  %v1089_v46 = vadd.f32 %v1070_v43, %v981_v42  ;;  %v979_v47 = vadd.f32 %v970_v37, %v951_v38 }
 0x166   : > { %v952_v49 = vmul.f32 %v947_v48, %v922_v44  ;;  %v1940_v50 = vpop.f32.mrb[26].mxu0  ;;  %1736 = vmatmul.mubr.msk.f32.vlgmr.msra.gmra.mrb[28].mxu0 %vm1503_vm1, %v1089_v46  ;;  %v983_v51 = vmax.f32 %v979_v47, 0.0  ;;  %v1464_v22 = vpop.permute.xlu0 %1463 }
 0x167   : > { %v1080_v53 = vpop.f32.mrb[27].mxu0  ;;  %1586 = vmatprep.mubr.f32.mxu0 %v2335_v32 }
 0x168   : > { %v980_v54 = vadd.f32 %v975_v52, %v952_v49  ;;  %v1091_v55 = vadd.f32 %v1080_v53, %v983_v51 }
 0x16a   : > { %v984_v56 = vmax.f32 %v980_v54, 0.0  ;;  %1737 = vmatmul.mubr.msk.f32.gmra.mrb[30].mxu0 %vm1503_vm1, %v1090_v45 }
 0x16b   : > { %1592 = vmatprep.mubr.f32.mxu0 %v2335_v32 }
 0x16c   : > { %v1092_v57 = vadd.f32 %v1940_v50, %v984_v56 }
 0x16e   : > { %1738 = vmatmul.mubr.msk.f32.gmra.mrb[32].mxu0 %vm1503_vm1, %v1091_v55 }
 0x16f   : > { %1598 = vmatprep.mubr.f32.mxu0 %v2335_v32 }
 0x172   : > { %1739 = vmatmul.mubr.msk.f32.gmra.mrb[34].mxu0 %vm1503_vm1, %v1092_v57 }
 0x193   : > { %v1392_v58 = vpop.f32.mrb[8].mxu1 }
 0x194   : > { %v1394_v59 = vpop.f32.mrb[9].mxu1  ;;  %v1439_v5 = vmul.f32 %v1422_v2, %v1392_v58 }
 0x195   : > { %v1440_v7 = vmul.f32 %v1422_v2, %v1394_v59 }
 0x196   : > { %v1471_v32 = vadd.f32 %v1454_v8, %v1439_v5 }
 0x197   : > { %v1398_v60 = vpop.f32.mrb[10].mxu1  ;;  %v1472_v10 = vadd.f32 %v1454_v8, %v1440_v7 }
 0x198   : > { %v1400_v61 = vpop.f32.mrb[11].mxu1  ;;  %v1441_v9 = vmul.f32 %v1427_v3, %v1398_v60  ;;  %v1479_v15 = vmax.f32 %v1471_v32, 0.0 }
 0x199   : > { %v1442_v11 = vmul.f32 %v1427_v3, %v1400_v61  ;;  %v1480_v19 = vmax.f32 %v1472_v10, 0.0 }
 0x19a   : > { %v1473_v13 = vadd.f32 %v1459_v12, %v1441_v9 }
 0x19b   : > { %v1404_v62 = vpop.f32.mrb[12].mxu1  ;;  %v1474_v16 = vadd.f32 %v1459_v12, %v1442_v11 }
 0x19c   : > { %v1406_v63 = vpop.f32.mrb[13].mxu1  ;;  %v1443_v14 = vmul.f32 %v1432_v4, %v1404_v62  ;;  %v1481_v26 = vmax.f32 %v1473_v13, 0.0 }
 0x19d   : > { %v1444_v17 = vmul.f32 %v1432_v4, %v1406_v63  ;;  %v1482_v30 = vmax.f32 %v1474_v16, 0.0 }
 0x19e   : > { %v1475_v24 = vadd.f32 %v1464_v22, %v1443_v14 }
 0x19f   : > { %v1410_v0 = vpop.f32.mrb[14].mxu1  ;;  %v1476_v27 = vadd.f32 %v1464_v22, %v1444_v17 }
 0x1a0   : > { %v1412_v1 = vpop.f32.mrb[15].mxu1  ;;  %v1445_v25 = vmul.f32 %v1437_v6, %v1410_v0  ;;  %v1483_v37 = vmax.f32 %v1475_v24, 0.0 }
 0x1a1   : > { %v1446_v28 = vmul.f32 %v1437_v6, %v1412_v1  ;;  %v1484_v40 = vmax.f32 %v1476_v27, 0.0 }
 0x1a2   : > { %v1477_v36 = vadd.f32 %v1469_v34, %v1445_v25 }
 0x1a3   : > { %v1478_v38 = vadd.f32 %v1469_v34, %v1446_v28 }
 0x1a4   : > { %v1485_v44 = vmax.f32 %v1477_v36, 0.0 }
 0x1a5   : > { %v1486_v46 = vmax.f32 %v1478_v38, 0.0 }
 0x239   : > { %v1582_v18 = vpop.f32.mrb[28].mxu0 }
 0x23a   : > { %v1605_v20 = vadd.f32 %v1582_v18, %v1479_v15  ;;  %v1584_v21 = vpop.f32.mrb[29].mxu0 }
 0x23b   : > { %v1606_v23 = vadd.f32 %v1584_v21, %v1480_v19 }
 0x23c   : > { %1613 = vst [vmem:[%s2993_s13] sm:$0xff] %v1605_v20 }
 0x23d   : > { %1614 = vst [vmem:[%s2993_s13 + $0x8] sm:$0xff] %v1606_v23  ;;  %v1588_v29 = vpop.f32.mrb[30].mxu0 }
 0x23e   : > { %v1607_v31 = vadd.f32 %v1588_v29, %v1481_v26  ;;  %v1590_v33 = vpop.f32.mrb[31].mxu0 }
 0x23f   : > { %v1608_v35 = vadd.f32 %v1590_v33, %v1482_v30 }
 0x240   : > { %1615 = vst [vmem:[%s2993_s13 + $0x10] sm:$0xff] %v1607_v31 }
 0x241   : > { %1616 = vst [vmem:[%s2993_s13 + $0x18] sm:$0xff] %v1608_v35  ;;  %v1594_v39 = vpop.f32.mrb[32].mxu0 }
 0x242   : > { %v1609_v41 = vadd.f32 %v1594_v39, %v1483_v37  ;;  %v1596_v42 = vpop.f32.mrb[33].mxu0 }
 0x243   : > { %v1610_v43 = vadd.f32 %v1596_v42, %v1484_v40 }
 0x244   : > { %1617 = vst [vmem:[%s2993_s13 + $0x20] sm:$0xff] %v1609_v41 }
 0x245   : > { %1618 = vst [vmem:[%s2993_s13 + $0x28] sm:$0xff] %v1610_v43  ;;  %v1600_v45 = vpop.f32.mrb[34].mxu0 }
 0x246   : > { %v1611_v47 = vadd.f32 %v1600_v45, %v1485_v44  ;;  %v1602_v48 = vpop.f32.mrb[35].mxu0 }
 0x247   : > { %v1612_v49 = vadd.f32 %v1602_v48, %v1486_v46 }
 0x248   : > { %1619 = vst [vmem:[%s2993_s13 + $0x30] sm:$0xff] %v1611_v47 }
 0x249   : > { %1620 = vst [vmem:[%s2993_s13 + $0x38] sm:$0xff] %v1612_v49 }
 0x24a   : > { %2283 = shalt.err (!%p2280_p3)
}
 0x24b   : > { %s2284_s12 = scalar_lea.hbm %s3006_s22, 1024  ;;  %s2288_s30 = scalar_lea.hbm %s3066_s11, 2048 }
 0x24c   : > { %p2285_p4 = scmp.ne.s32.totalorder %s3006_s22, %s2284_s12  ;;  %p2289_p9 = scmp.lt.u32.totalorder %s3006_s22, %s3066_s11 }
 0x24d   : > { %p2290_p10 = scmp.lt.u32.totalorder %s2288_s30, %s2284_s12  ;;  %p2292_p12 = scmp.lt.u32.totalorder %s2284_s12, %s3006_s22 }
 0x24e   : > { %p2286_p7 = pnand %p2285_p4, %p2437_p5 }
 0x24f   : > { %p2291_p11 = por %p2290_p10, %p2289_p9 }
 0x250   : > { %p2287_p8 = pneg %p2286_p7 }
 0x251   : > { %p2293_p13 = por %p2292_p12, %p2291_p11 }
 0x253   : > { %p2294_p0 = pnand %p2293_p13, %p2287_p8 }
 0x255   : > { %2297 = shalt.err (!%p2294_p0)
}
 0x256   : > { %s2337_s29 = smov 256   ;;  %s2338_s14 = smov 16  }
 0x257   : > { %2225 = dma.vmem_to_hbm [thread:$0]  (%p2437_p5), %s3008_s24, 1024, %s3006_s22, %s3014_s21, %s2337_s29, %s2337_s29, %s2338_s14  }
 0x258 PF: > { %p2231_p1 = scmp.ge.s32.totalorder %s2332_s20, 2  ;;  %s1650_s15 = sand.u32 1, %s2320_s17  }
 0x259   : > { %s1651_s12 = scalar_lea.sflag [#allocation3], %s1650_s15 }
 0x25a   : > { %p2228_p2 = pnand %p2231_p1, %p2441_p6 }
 0x25c   : > { %2315 = dma.done.wait (!%p2228_p2), %s1651_s12, 1024  }
 0x25d   : > { %2317 = vsyncadd (!%p2228_p2), %s1651_s12, 4294966272  ;;  %p21_p3 = scmp.ge.s32.totalorder %s2424_s23, 4   ;;  %s3071_s17 = smov %s2324_s18 }
 0x25e   : > { %s3072_s18 = smov %s2328_s19  ;;  %s3073_s19 = smov %s2435_s26 }
 0x25f   : > { %s3074_s20 = smov %s2424_s23  ;;  %23 = sbr.rel (!%p21_p3) target bundleno = 5 (0x5), region = 105 }
 0x266   :  { %1656 = vsyncpa [#allocation3], 1 }
 0x267   :  { %1658 = vsyncpa [#allocation3 + $0x1], 1 }

</bundles_post_ra>
